<compile_context>
chip_gen: v7x
topology: tpu7x:2x2x1
jax: 0.10.0
libtpu: 0.0.40
codegen_flags: <defaults>
</compile_context>

<pallas_src>
import functools

import jax
import jax.numpy as jnp
from jax.experimental import pallas as pl
from jax.experimental.pallas import tpu as pltpu

LANE = 128            # TPU lane width; fc output padded to this
FC_IN = 2048          # inception.fc.in_features
STEM_OUT = 32         # Conv2d_1a_3x3 output channels
STEM_PAD = 128        # stem activation lanes (32 real + 1 constant + zero pad)
KDIM = 27             # 3*3*3 im2col patch width
PATCH_LANES = 32      # 27 patch values + 1 constant-one lane + 4 zero pad
CONST_LANE = KDIM     # index of the constant-1 lane in the patch vector (27)
CONST_STEM = STEM_OUT  # index of the constant-1 lane in the stem activation (32)


# ----------------------------------------------------------------------------
# Kernel 1: stem matmul -> trunk matmul -> MXU global-avg-pool accumulation
# ----------------------------------------------------------------------------
def _pool_trunk_kernel(patches_ref, w_stem_ref, w_trunk_ref, out_ref, acc_ref,
                       *, tile_m, inv_hw):
    # NOTE: the pool accumulator scratch is only correct because (a) the `t` axis is
    # sequential ("arbitrary", innermost) and (b) scratch is private per TensorCore under
    # the "parallel" batch axis.  Do not reorder / parallelize `t`.
    t = pl.program_id(1)

    @pl.when(t == 0)
    def _zero_acc():
        acc_ref[...] = jnp.zeros_like(acc_ref)

    # Stem conv (im2col already applied). Bias is folded: patch lane CONST_LANE is 1.0 for
    # real spatial rows and 0.0 for padded rows, and W_stem[CONST_LANE] holds b_stem plus a
    # 1.0 in column CONST_STEM (which carries the trunk bias in the next matmul).
    stem = jnp.dot(patches_ref[...], w_stem_ref[...],
                   preferred_element_type=jnp.float32)
    stem = jnp.maximum(stem, 0.0).astype(jnp.bfloat16)          # [tile_m, STEM_PAD]

    # Trunk stand-in projection to FC_IN channels; b_trunk folded via stem lane CONST_STEM.
    trunk = jnp.dot(stem, w_trunk_ref[...],
                    preferred_element_type=jnp.float32)
    trunk = jnp.maximum(trunk, 0.0).astype(jnp.bfloat16)        # [tile_m, FC_IN] bf16

    # Global-average-pool accumulation as an MXU column-sum (padded spatial rows are exactly
    # zero because their constant lane is zero, so no mask is needed).
    ones_row = jnp.ones((1, tile_m), jnp.bfloat16)
    acc_ref[...] += jnp.dot(ones_row, trunk, preferred_element_type=jnp.float32)

    # Last spatial tile of this image: finalize the pooled feature vector.
    @pl.when(t == pl.num_programs(1) - 1)
    def _finalize():
        out_ref[...] = (acc_ref[...] * inv_hw).reshape((1, 1, FC_IN)).astype(out_ref.dtype)


def _vmem_limit_bytes(tile_m):
    """Rough VMEM budget: double-buffered patch tile + resident weights + live intermediates."""
    patches = 2 * tile_m * PATCH_LANES * 2                       # bf16, double-buffered
    weights = 2 * (PATCH_LANES * STEM_PAD + STEM_PAD * FC_IN) * 2
    inter = tile_m * FC_IN * (4 + 2) + tile_m * STEM_PAD * (4 + 2)
    est = patches + weights + inter + 4 * FC_IN * 4
    # 2x margin for compiler scratch; cap well below v7x's 64 MiB per-TC physical VMEM
    # at the default tile_m (raise tile_m only on v5e/v6e's 128 MiB parts).
    return int(min(96 * 1024 * 1024, 2 * est + (4 << 20)))


def _pool_trunk_call(patches, params, *, batch, hw, hw_pad, tile_m):
    n_t = hw_pad // tile_m
    kernel = functools.partial(_pool_trunk_kernel, tile_m=tile_m, inv_hw=1.0 / hw)
    return pl.pallas_call(
        kernel,
        out_shape=jax.ShapeDtypeStruct((batch, 1, FC_IN), jnp.float32),
        grid_spec=pltpu.PrefetchScalarGridSpec(
            num_scalar_prefetch=0,
            grid=(batch, n_t),
            in_specs=[
                # im2col patches, [B*HW_pad, 32] bf16 -> one row tile per step
                pl.BlockSpec((tile_m, PATCH_LANES), lambda b, t: (b * n_t + t, 0)),
                # resident weights (constant index across the whole grid)
                pl.BlockSpec((PATCH_LANES, STEM_PAD), lambda b, t: (0, 0)),   # W_stem
                pl.BlockSpec((STEM_PAD, FC_IN), lambda b, t: (0, 0)),         # W_trunk
            ],
            out_specs=pl.BlockSpec((1, 1, FC_IN), lambda b, t: (b, 0, 0)),
            scratch_shapes=[pltpu.VMEM((1, FC_IN), jnp.float32)],             # pool acc
        ),
        compiler_params=pltpu.CompilerParams(
            # Batch axis is "parallel": on v7x (2 TensorCores/chip) use B >= 2 per chip so
            # both cores get work; v5e/v6e are single-TC so this is a no-op there.
            dimension_semantics=("parallel", "arbitrary"),
            vmem_limit_bytes=_vmem_limit_bytes(tile_m),
        ),
    )(patches, params["w_stem"], params["w_trunk"])


# ----------------------------------------------------------------------------
# Kernel 2: batched fc head  (pooled @ W_fc + b) -> ReLU -> Dropout(0.5)
# ----------------------------------------------------------------------------
def _fc_head_kernel(pooled_ref, w_fc_ref, b_fc_ref, u_ref, out_ref, *, train):
    y = jnp.dot(pooled_ref[...].astype(jnp.bfloat16), w_fc_ref[...],
                preferred_element_type=jnp.float32)
    y = jnp.maximum(y + b_fc_ref[...], 0.0)                      # ReLU
    if train:
        # Dropout p=0.5 (training semantics): drop where u < 0.5, scale survivors by 2.
        y = jnp.where(u_ref[...] < 0.5, 0.0, y * 2.0)
    out_ref[...] = y.astype(out_ref.dtype)


def _fc_head_call(pooled, params, u, *, batch, train):
    kernel = functools.partial(_fc_head_kernel, train=train)
    return pl.pallas_call(
        kernel,
        out_shape=jax.ShapeDtypeStruct((batch, LANE), jnp.float32),
        grid=(1,),
        in_specs=[
            pl.BlockSpec((batch, FC_IN), lambda i: (0, 0)),
            pl.BlockSpec((FC_IN, LANE), lambda i: (0, 0)),
            pl.BlockSpec((1, LANE), lambda i: (0, 0)),
            pl.BlockSpec((batch, LANE), lambda i: (0, 0)),
        ],
        out_specs=pl.BlockSpec((batch, LANE), lambda i: (0, 0)),
    )(pooled, params["w_fc"], params["b_fc"], u)


# ----------------------------------------------------------------------------
# Glue: im2col directly into the 32-lane, tile-aligned layout (+ constant-1 lane)
# ----------------------------------------------------------------------------
def im2col_3x3_s2(x_nhwc, hw_pad):
    """3x3 stride-2 VALID patches -> [B, hw_pad, PATCH_LANES].

    Lane CONST_LANE is 1.0 for real spatial rows (bias fold); padded rows are all zero so
    they contribute exactly zero through stem and trunk (no masking needed downstream).
    """
    B, H, W, C = x_nhwc.shape
    k, s = 3, 2
    Ho = (H - k) // s + 1
    Wo = (W - k) // s + 1
    cols = [x_nhwc[:, di:di + s * Ho:s, dj:dj + s * Wo:s, :]
            for di in range(k) for dj in range(k)]
    p = jnp.concatenate(cols, axis=-1).reshape(B, Ho * Wo, k * k * C)   # [B, HW, 27]
    ones = jnp.ones((B, Ho * Wo, 1), p.dtype)
    p = jnp.concatenate([p, ones], axis=-1)                              # [B, HW, 28]
    p = jnp.pad(p, ((0, 0), (0, hw_pad - Ho * Wo), (0, PATCH_LANES - (k * k * C + 1))))
    return p


def init_params(key, embed_size, cin=3):
    """Synthetic, bias-folded parameters (pretrained InceptionV3 weights are N/A here)."""
    k1, k2, k3, k4, k5 = jax.random.split(key, 5)
    kdim = 3 * 3 * cin
    w_conv = 0.05 * jax.random.normal(k1, (kdim, STEM_OUT), jnp.float32)
    b_stem = 0.05 * jax.random.normal(k4, (STEM_OUT,), jnp.float32)
    w_proj = 0.05 * jax.random.normal(k2, (STEM_OUT, FC_IN), jnp.float32)
    b_trunk = 0.05 * jax.random.normal(k5, (FC_IN,), jnp.float32)
    w_head = 0.02 * jax.random.normal(k3, (FC_IN, embed_size), jnp.float32)

    # Stem weight with bias folded: patch lane CONST_LANE (constant 1.0) carries b_stem and
    # also writes 1.0 into stem lane CONST_STEM so the trunk bias folds the same way.
    w_stem = jnp.zeros((PATCH_LANES, STEM_PAD), jnp.float32)
    w_stem = w_stem.at[:kdim, :STEM_OUT].set(w_conv)
    w_stem = w_stem.at[CONST_LANE, :STEM_OUT].set(b_stem)
    w_stem = w_stem.at[CONST_LANE, CONST_STEM].set(1.0)

    w_trunk = jnp.zeros((STEM_PAD, FC_IN), jnp.float32)
    w_trunk = w_trunk.at[:STEM_OUT, :].set(w_proj)
    w_trunk = w_trunk.at[CONST_STEM, :].set(b_trunk)

    w_fc = jnp.zeros((FC_IN, LANE), jnp.float32).at[:, :embed_size].set(w_head)
    b_fc = jnp.zeros((1, LANE), jnp.float32)

    return dict(
        w_stem=w_stem.astype(jnp.bfloat16),
        w_trunk=w_trunk.astype(jnp.bfloat16),
        w_fc=w_fc.astype(jnp.bfloat16),
        b_fc=b_fc,
    )


@functools.partial(jax.jit, static_argnames=("embed_size", "train", "tile_m"))
def encoder_forward(images_nchw, params, rng_key, *, embed_size,
                    train=True, tile_m=1024):
    # PyTorch gives NCHW; convert to NHWC for the im2col path.
    x = jnp.transpose(images_nchw, (0, 2, 3, 1)).astype(jnp.float32)
    B, H, W, _ = x.shape
    k, s = 3, 2
    Ho = (H - k) // s + 1
    Wo = (W - k) // s + 1
    hw = Ho * Wo
    hw_pad = ((hw + tile_m - 1) // tile_m) * tile_m

    patches = im2col_3x3_s2(x, hw_pad)
    patches = patches.reshape(B * hw_pad, PATCH_LANES).astype(jnp.bfloat16)

    # Hot loop: stem + trunk + global average pool.
    pooled = _pool_trunk_call(patches, params, batch=B, hw=hw,
                              hw_pad=hw_pad, tile_m=tile_m)
    pooled = pooled.reshape(B, FC_IN)

    # Batched fc head: Linear -> ReLU -> Dropout(0.5).
    # Per-call, per-image dropout randomness (traced key: no recompiles).
    u = jax.random.uniform(rng_key, (B, LANE), jnp.float32)
    out = _fc_head_call(pooled, params, u, batch=B, train=train)
    return out[:, :embed_size]


# ----------------------------------------------------------------------------
if __name__ == "__main__":
    embed_size = 32
    key = jax.random.PRNGKey(0)
    kp, kx, kd = jax.random.split(key, 3)

    params = init_params(kp, embed_size)
    # Small NCHW images consistent with the module's image input: [B=2, C=3, H=32, W=32].
    images = jax.random.normal(kx, (2, 3, 32, 32), jnp.float32)

    # tile_m=128 on the toy shape exercises multi-tile pool accumulation (HW=225 -> 2 tiles).
    out = encoder_forward(images, params, kd, embed_size=embed_size,
                          train=True, tile_m=128)
    out = jax.block_until_ready(out)

    assert out.shape == (2, embed_size), out.shape
    assert bool(jnp.all(out >= 0.0))  # ReLU + dropout keeps outputs non-negative
    print("KERNEL_OK")
</pallas_src>

<mosaic_0001>
module attributes {stable_mosaic.version = 11 : i64} {
  func.func @_pool_trunk_kernel(%arg0: i32, %arg1: i32, %arg2: memref<128x32xbf16, #tpu.memory_space<vmem>>, %arg3: memref<32x128xbf16, #tpu.memory_space<vmem>>, %arg4: memref<128x2048xbf16, #tpu.memory_space<vmem>>, %arg5: memref<1x1x2048xf32, #tpu.memory_space<vmem>>, %arg6: memref<1x2048xf32, #tpu.memory_space<vmem>>) attributes {dimension_semantics = [#tpu.dimension_semantics<parallel>, #tpu.dimension_semantics<arbitrary>], iteration_bounds = array<i64: 2, 2>, scalar_prefetch = 0 : i64, scratch_operands = 1 : i64, tpu.core_type = #tpu.core_type<tc>, window_params = [{transform_indices = @transform_0, window_bounds = array<i64: 128, 32>}, {pipeline_mode = #tpu.pipeline_mode<synchronous>, transform_indices = @transform_1, window_bounds = array<i64: 32, 128>}, {pipeline_mode = #tpu.pipeline_mode<synchronous>, transform_indices = @transform_2, window_bounds = array<i64: 128, 2048>}, {transform_indices = @transform_3, window_bounds = array<i64: 1, 1, 2048>}]} {
    %c0_i32 = arith.constant 0 : i32
    %0 = arith.cmpi eq, %arg1, %c0_i32 : i32
    %1 = arith.extui %0 : i1 to i32
    %c0_i32_0 = arith.constant 0 : i32
    %2 = arith.cmpi ne, %1, %c0_i32_0 : i32
    scf.if %2 {
      %cst_16 = arith.constant 0.000000e+00 : f32
      %22 = vector.broadcast %cst_16 : f32 to vector<1x2048xf32>
      %c0_17 = arith.constant 0 : index
      %c0_18 = arith.constant 0 : index
      %23 = vector.load %arg6[%c0_17, %c0_18] : memref<1x2048xf32, #tpu.memory_space<vmem>>, vector<1x2048xf32>
      tpu.vector_store %arg6[%c0_17, %c0_18], %22 {strides = array<i32>} : memref<1x2048xf32, #tpu.memory_space<vmem>>, vector<1x2048xf32>,
    } else {
    }
    %c0 = arith.constant 0 : index
    %c0_1 = arith.constant 0 : index
    %3 = vector.load %arg2[%c0, %c0_1] : memref<128x32xbf16, #tpu.memory_space<vmem>>, vector<128x32xbf16>
    %c0_2 = arith.constant 0 : index
    %c0_3 = arith.constant 0 : index
    %4 = vector.load %arg3[%c0_2, %c0_3] : memref<32x128xbf16, #tpu.memory_space<vmem>>, vector<32x128xbf16>
    %cst = arith.constant dense<0.000000e+00> : vector<128x128xf32>
    %5 = tpu.matmul %3, %4, %cst {dimension_numbers = #tpu.dot_dimension_numbers<[1], [0], [0], [1], [0, 0, 1, 1], [], []>} : vector<128x32xbf16>, vector<32x128xbf16>, vector<128x128xf32> -> vector<128x128xf32>
    %cst_4 = arith.constant 0.000000e+00 : f32
    %6 = vector.broadcast %cst_4 : f32 to vector<128x128xf32>
    %7 = arith.maximumf %5, %6 : vector<128x128xf32>
    %8 = arith.truncf %7 : vector<128x128xf32> to vector<128x128xbf16>
    %c0_5 = arith.constant 0 : index
    %c0_6 = arith.constant 0 : index
    %9 = vector.load %arg4[%c0_5, %c0_6] : memref<128x2048xbf16, #tpu.memory_space<vmem>>, vector<128x2048xbf16>
    %cst_7 = arith.constant dense<0.000000e+00> : vector<128x2048xf32>
    %10 = tpu.matmul %8, %9, %cst_7 {dimension_numbers = #tpu.dot_dimension_numbers<[1], [0], [0], [1], [0, 0, 1, 1], [], []>} : vector<128x128xbf16>, vector<128x2048xbf16>, vector<128x2048xf32> -> vector<128x2048xf32>
    %cst_8 = arith.constant 0.000000e+00 : f32
    %11 = vector.broadcast %cst_8 : f32 to vector<128x2048xf32>
    %12 = arith.maximumf %10, %11 : vector<128x2048xf32>
    %13 = arith.truncf %12 : vector<128x2048xf32> to vector<128x2048xbf16>
    %cst_9 = arith.constant 1.000000e+00 : bf16
    %14 = vector.broadcast %cst_9 : bf16 to vector<1x128xbf16>
    %c0_10 = arith.constant 0 : index
    %c0_11 = arith.constant 0 : index
    %15 = vector.load %arg6[%c0_10, %c0_11] : memref<1x2048xf32, #tpu.memory_space<vmem>>, vector<1x2048xf32>
    %cst_12 = arith.constant dense<0.000000e+00> : vector<1x2048xf32>
    %16 = tpu.matmul %14, %13, %cst_12 {dimension_numbers = #tpu.dot_dimension_numbers<[1], [0], [0], [1], [0, 0, 1, 1], [], []>} : vector<1x128xbf16>, vector<128x2048xbf16>, vector<1x2048xf32> -> vector<1x2048xf32>
    %17 = arith.addf %15, %16 : vector<1x2048xf32>
    %c0_13 = arith.constant 0 : index
    %c0_14 = arith.constant 0 : index
    %18 = vector.load %arg6[%c0_13, %c0_14] : memref<1x2048xf32, #tpu.memory_space<vmem>>, vector<1x2048xf32>
    tpu.vector_store %arg6[%c0_13, %c0_14], %17 {strides = array<i32>} : memref<1x2048xf32, #tpu.memory_space<vmem>>, vector<1x2048xf32>,
    %c1_i32 = arith.constant 1 : i32
    %19 = arith.cmpi eq, %arg1, %c1_i32 : i32
    %20 = arith.extui %19 : i1 to i32
    %c0_i32_15 = arith.constant 0 : i32
    %21 = arith.cmpi ne, %20, %c0_i32_15 : i32
    scf.if %21 {
      %c0_16 = arith.constant 0 : index
      %c0_17 = arith.constant 0 : index
      %22 = vector.load %arg6[%c0_16, %c0_17] : memref<1x2048xf32, #tpu.memory_space<vmem>>, vector<1x2048xf32>
      %cst_18 = arith.constant 0.00444444455 : f32
      %23 = vector.broadcast %cst_18 : f32 to vector<1x2048xf32>
      %24 = arith.mulf %22, %23 : vector<1x2048xf32>
      %25 = vector.shape_cast %24 : vector<1x2048xf32> to vector<1x1x2048xf32>
      %c0_19 = arith.constant 0 : index
      %c0_20 = arith.constant 0 : index
      %c0_21 = arith.constant 0 : index
      %26 = vector.load %arg5[%c0_19, %c0_20, %c0_21] : memref<1x1x2048xf32, #tpu.memory_space<vmem>>, vector<1x1x2048xf32>
      tpu.vector_store %arg5[%c0_19, %c0_20, %c0_21], %25 {strides = array<i32>} : memref<1x1x2048xf32, #tpu.memory_space<vmem>>, vector<1x1x2048xf32>,
    } else {
    }
    return
  }
  func.func @transform_0(%arg0: i32, %arg1: i32) -> (i32, i32) {
    %c2_i32 = arith.constant 2 : i32
    %0 = arith.muli %arg0, %c2_i32 : i32
    %1 = arith.addi %0, %arg1 : i32
    %c0_i32 = arith.constant 0 : i32
    %c0_i32_0 = arith.constant 0 : i32
    return %1, %c0_i32 : i32, i32
  }
  func.func @transform_1(%arg0: i32, %arg1: i32) -> (i32, i32) {
    %c0_i32 = arith.constant 0 : i32
    %c0_i32_0 = arith.constant 0 : i32
    %c0_i32_1 = arith.constant 0 : i32
    return %c0_i32, %c0_i32_0 : i32, i32
  }
  func.func @transform_2(%arg0: i32, %arg1: i32) -> (i32, i32) {
    %c0_i32 = arith.constant 0 : i32
    %c0_i32_0 = arith.constant 0 : i32
    %c0_i32_1 = arith.constant 0 : i32
    return %c0_i32, %c0_i32_0 : i32, i32
  }
  func.func @transform_3(%arg0: i32, %arg1: i32) -> (i32, i32, i32) {
    %c0_i32 = arith.constant 0 : i32
    %c0_i32_0 = arith.constant 0 : i32
    %c0_i32_1 = arith.constant 0 : i32
    return %arg0, %c0_i32, %c0_i32_0 : i32, i32, i32
  }
}

module attributes {stable_mosaic.version = 11 : i64} {
  func.func @_fc_head_kernel(%arg0: i32, %arg1: memref<2x2048xf32, #tpu.memory_space<vmem>>, %arg2: memref<2048x128xbf16, #tpu.memory_space<vmem>>, %arg3: memref<1x128xf32, #tpu.memory_space<vmem>>, %arg4: memref<2x128xf32, #tpu.memory_space<vmem>>, %arg5: memref<2x128xf32, #tpu.memory_space<vmem>>) attributes {dimension_semantics = [#tpu.dimension_semantics<arbitrary>], iteration_bounds = array<i64: 1>, scalar_prefetch = 0 : i64, scratch_operands = 0 : i64, tpu.core_type = #tpu.core_type<tc>, window_params = [{pipeline_mode = #tpu.pipeline_mode<synchronous>, transform_indices = @transform_0, window_bounds = array<i64: 2, 2048>}, {pipeline_mode = #tpu.pipeline_mode<synchronous>, transform_indices = @transform_1, window_bounds = array<i64: 2048, 128>}, {pipeline_mode = #tpu.pipeline_mode<synchronous>, transform_indices = @transform_2, window_bounds = array<i64: 1, 128>}, {pipeline_mode = #tpu.pipeline_mode<synchronous>, transform_indices = @transform_3, window_bounds = array<i64: 2, 128>}, {pipeline_mode = #tpu.pipeline_mode<synchronous>, transform_indices = @transform_4, window_bounds = array<i64: 2, 128>}]} {
    %c0 = arith.constant 0 : index
    %c0_0 = arith.constant 0 : index
    %0 = vector.load %arg1[%c0, %c0_0] : memref<2x2048xf32, #tpu.memory_space<vmem>>, vector<2x2048xf32>
    %1 = arith.truncf %0 : vector<2x2048xf32> to vector<2x2048xbf16>
    %c0_1 = arith.constant 0 : index
    %c0_2 = arith.constant 0 : index
    %2 = vector.load %arg2[%c0_1, %c0_2] : memref<2048x128xbf16, #tpu.memory_space<vmem>>, vector<2048x128xbf16>
    %cst = arith.constant dense<0.000000e+00> : vector<2x128xf32>
    %3 = tpu.matmul %1, %2, %cst {dimension_numbers = #tpu.dot_dimension_numbers<[1], [0], [0], [1], [0, 0, 1, 1], [], []>} : vector<2x2048xbf16>, vector<2048x128xbf16>, vector<2x128xf32> -> vector<2x128xf32>
    %c0_3 = arith.constant 0 : index
    %c0_4 = arith.constant 0 : index
    %4 = vector.load %arg3[%c0_3, %c0_4] : memref<1x128xf32, #tpu.memory_space<vmem>>, vector<1x128xf32>
    %5 = vector.broadcast %4 : vector<1x128xf32> to vector<2x128xf32>
    %6 = arith.addf %3, %5 : vector<2x128xf32>
    %cst_5 = arith.constant 0.000000e+00 : f32
    %7 = vector.broadcast %cst_5 : f32 to vector<2x128xf32>
    %8 = arith.maximumf %6, %7 : vector<2x128xf32>
    %c0_6 = arith.constant 0 : index
    %c0_7 = arith.constant 0 : index
    %9 = vector.load %arg4[%c0_6, %c0_7] : memref<2x128xf32, #tpu.memory_space<vmem>>, vector<2x128xf32>
    %cst_8 = arith.constant 5.000000e-01 : f32
    %10 = vector.broadcast %cst_8 : f32 to vector<2x128xf32>
    %11 = arith.cmpf olt, %9, %10 : vector<2x128xf32>
    %cst_9 = arith.constant 2.000000e+00 : f32
    %12 = vector.broadcast %cst_9 : f32 to vector<2x128xf32>
    %13 = arith.mulf %8, %12 : vector<2x128xf32>
    %cst_10 = arith.constant 0.000000e+00 : f32
    %14 = vector.broadcast %cst_10 : f32 to vector<2x128xf32>
    %15 = arith.select %11, %14, %13 : vector<2x128xi1>, vector<2x128xf32>
    %c0_11 = arith.constant 0 : index
    %c0_12 = arith.constant 0 : index
    %16 = vector.load %arg5[%c0_11, %c0_12] : memref<2x128xf32, #tpu.memory_space<vmem>>, vector<2x128xf32>
    tpu.vector_store %arg5[%c0_11, %c0_12], %15 {strides = array<i32>} : memref<2x128xf32, #tpu.memory_space<vmem>>, vector<2x128xf32>,
    return
  }
  func.func @transform_0(%arg0: i32) -> (i32, i32) {
    %c0_i32 = arith.constant 0 : i32
    %c0_i32_0 = arith.constant 0 : i32
    %c0_i32_1 = arith.constant 0 : i32
    return %c0_i32, %c0_i32_0 : i32, i32
  }
  func.func @transform_1(%arg0: i32) -> (i32, i32) {
    %c0_i32 = arith.constant 0 : i32
    %c0_i32_0 = arith.constant 0 : i32
    %c0_i32_1 = arith.constant 0 : i32
    return %c0_i32, %c0_i32_0 : i32, i32
  }
  func.func @transform_2(%arg0: i32) -> (i32, i32) {
    %c0_i32 = arith.constant 0 : i32
    %c0_i32_0 = arith.constant 0 : i32
    %c0_i32_1 = arith.constant 0 : i32
    return %c0_i32, %c0_i32_0 : i32, i32
  }
  func.func @transform_3(%arg0: i32) -> (i32, i32) {
    %c0_i32 = arith.constant 0 : i32
    %c0_i32_0 = arith.constant 0 : i32
    %c0_i32_1 = arith.constant 0 : i32
    return %c0_i32, %c0_i32_0 : i32, i32
  }
  func.func @transform_4(%arg0: i32) -> (i32, i32) {
    %c0_i32 = arith.constant 0 : i32
    %c0_i32_0 = arith.constant 0 : i32
    %c0_i32_1 = arith.constant 0 : i32
    return %c0_i32, %c0_i32_0 : i32, i32
  }
}

</mosaic_0001>

<bundles_post_ra>
// kernel: encoder_forward.3
= control target key start
LH: loop header
LB: loop body
LE: loop exit
PB: predicated region body
PF: predicated region fallthrough
CT: control target
= control target key end

     0   :  { %v31_v28 = vlaneseq  ;;  %v1961_v36 = vmov 1983009808   ;;  %s2412_s0 = inlined_call_operand.vmem [shape: f32[2,2048], index: 0, kind: input, shape index: {}]   ;;  %s2413_s1 = inlined_call_operand.vmem [shape: bf16[2048,128], index: 1, kind: input, shape index: {}]   ;;  %s2414_s2 = inlined_call_operand.vmem [shape: f32[1,128], index: 2, kind: input, shape index: {}]   ;;  %s2415_s3 = inlined_call_operand.vmem [shape: f32[2,128], index: 3, kind: input, shape index: {}]   ;;  %s2416_s4 = inlined_call_operand.hbm [shape: f32[2,128], index: 4, kind: output, shape index: {}]  }
   0x1   :  { %v1805_v0 = vld [vmem:[%s2413_s1 + $0x40] sm:$0xff]   ;;  %v1809_v4 = vld [vmem:[%s2413_s1 + $0x48] sm:$0xff]   ;;  %v1813_v8 = vld [vmem:[%s2413_s1 + $0x50] sm:$0xff]   ;;  %v29_v37 = vunpack.c.l.s4 %v1961_v36 }
   0x2   :  { %v1806_v1 = vld [vmem:[%s2413_s1 + $0xc0] sm:$0xff]   ;;  %1627 = vmatprep.subr.bf16.mxu0 %v1805_v0  ;;  %v1810_v5 = vld [vmem:[%s2413_s1 + $0xc8] sm:$0xff]   ;;  %v1814_v9 = vld [vmem:[%s2413_s1 + $0xd0] sm:$0xff]   ;;  %v32_v33 = vshrl.u32 %v31_v28, 7 }
   0x3   :  { %v1807_v2 = vld [vmem:[%s2413_s1] sm:$0xff]   ;;  %1649 = vmatprep.subr.bf16.mxu1 %v1806_v1  ;;  %v1811_v6 = vld [vmem:[%s2413_s1 + $0x8] sm:$0xff]   ;;  %v1815_v10 = vld [vmem:[%s2413_s1 + $0x10] sm:$0xff]   ;;  %v30_v39 = vunpack.c.0.s8 %v29_v37 }
   0x4   :  { %v1808_v3 = vld [vmem:[%s2413_s1 + $0x80] sm:$0xff]   ;;  %1628 = vmatpush3.bf16.msra.mxu0 %v1807_v2  ;;  %v1812_v7 = vld [vmem:[%s2413_s1 + $0x88] sm:$0xff]   ;;  %v1816_v11 = vld [vmem:[%s2413_s1 + $0x90] sm:$0xff]  }
   0x5   :  { %1650 = vmatpush3.bf16.msra.mxu1 %v1808_v3  ;;  %1629 = vmatprep.subr.bf16.mxu0 %v1809_v4  ;;  %v1817_v12 = vld [vmem:[%s2413_s1 + $0x58] sm:$0xff]   ;;  %v1821_v16 = vld [vmem:[%s2413_s1 + $0x60] sm:$0xff]   ;;  %v1825_v20 = vld [vmem:[%s2413_s1 + $0x68] sm:$0xff]   ;;  %v2093_v41 = vsub.s32 %v30_v39, %v32_v33 }
   0x6   :  { %1651 = vmatprep.subr.bf16.mxu1 %v1810_v5  ;;  %v1818_v13 = vld [vmem:[%s2413_s1 + $0xd8] sm:$0xff]   ;;  %v1822_v17 = vld [vmem:[%s2413_s1 + $0xe0] sm:$0xff]   ;;  %v1826_v21 = vld [vmem:[%s2413_s1 + $0xe8] sm:$0xff]  }
   0x7   :  { %v1819_v14 = vld [vmem:[%s2413_s1 + $0x18] sm:$0xff]   ;;  %v1823_v18 = vld [vmem:[%s2413_s1 + $0x20] sm:$0xff]   ;;  %v1827_v22 = vld [vmem:[%s2413_s1 + $0x28] sm:$0xff]  }
   0x8   :  { %1630 = vmatpush3.bf16.msra.mxu0 %v1811_v6  ;;  %v1820_v15 = vld [vmem:[%s2413_s1 + $0x98] sm:$0xff]   ;;  %v1824_v19 = vld [vmem:[%s2413_s1 + $0xa0] sm:$0xff]   ;;  %v1828_v23 = vld [vmem:[%s2413_s1 + $0xa8] sm:$0xff]  }
   0x9   :  { %1652 = vmatpush3.bf16.msra.mxu1 %v1812_v7  ;;  %1631 = vmatprep.subr.bf16.mxu0 %v1813_v8  ;;  %v1829_v24 = vld [vmem:[%s2413_s1 + $0x70] sm:$0xff]   ;;  %v1833_v29 = vld [vmem:[%s2413_s1 + $0x78] sm:$0xff]   ;;  %v19_v34 = vld [vmem:[%s2412_s0] sm:$0xff] }
   0xa   :  { %1653 = vmatprep.subr.bf16.mxu1 %v1814_v9  ;;  %v1830_v25 = vld [vmem:[%s2413_s1 + $0xf0] sm:$0xff]   ;;  %v1834_v30 = vld [vmem:[%s2413_s1 + $0xf8] sm:$0xff]   ;;  %v1838_v35 = vld [vmem:[%s2413_s1 + $0x140] sm:$0xff]   ;;  %v27_v40 = vcombine.high %v19_v34, %v19_v34  ;;  %v34_v42 = vrot.slane %v19_v34, %v2093_v41 }
   0xb   :  { %v1831_v26 = vld [vmem:[%s2413_s1 + $0x30] sm:$0xff]   ;;  %v1835_v31 = vld [vmem:[%s2413_s1 + $0x38] sm:$0xff]   ;;  %v1839_v38 = vld [vmem:[%s2413_s1 + $0x1c0] sm:$0xff]  }
   0xc   :  { %1632 = vmatpush3.bf16.msra.mxu0 %v1815_v10  ;;  %v1832_v27 = vld [vmem:[%s2413_s1 + $0xb0] sm:$0xff]   ;;  %v1836_v32 = vld [vmem:[%s2413_s1 + $0xb8] sm:$0xff]   ;;  %v41_v43 = vrot.slane %v27_v40, %v2093_v41  ;;  %v42_v44 = vcombine.high %v34_v42, %v34_v42  ;;  %v1840_v46 = vld [vmem:[%s2413_s1 + $0x100] sm:$0xff]   ;;  %v111_v47 = vpack.c.bf16 %v34_v42, %v34_v42 }
   0xd   :  { %1654 = vmatpush3.bf16.msra.mxu1 %v1816_v11  ;;  %1633 = vmatprep.subr.bf16.mxu0 %v1817_v12  ;;  %v1841_v49 = vld [vmem:[%s2413_s1 + $0x180] sm:$0xff]   ;;  %v1842_v52 = vld [vmem:[%s2413_s1 + $0x148] sm:$0xff]   ;;  %v1846_v56 = vld [vmem:[%s2413_s1 + $0x150] sm:$0xff]  }
   0xe   :  { %1655 = vmatprep.subr.bf16.mxu1 %v1818_v13  ;;  %v43_v45 = vcombine.high %v41_v43, %v41_v43  ;;  %v113_v48 = vpack.c.bf16 %v41_v43, %v41_v43  ;;  %v112_v50 = vpack.c.bf16 %v42_v44, %v42_v44  ;;  %v1843_v53 = vld [vmem:[%s2413_s1 + $0x1c8] sm:$0xff]   ;;  %v1847_v57 = vld [vmem:[%s2413_s1 + $0x1d0] sm:$0xff]   ;;  %v1850_v60 = vld [vmem:[%s2413_s1 + $0x158] sm:$0xff]  }
   0xf   :  { %v1844_v54 = vld [vmem:[%s2413_s1 + $0x108] sm:$0xff]   ;;  %v1848_v58 = vld [vmem:[%s2413_s1 + $0x110] sm:$0xff]   ;;  %v1851_v61 = vld [vmem:[%s2413_s1 + $0x1d8] sm:$0xff]  }
  0x10   :  { %1634 = vmatpush3.bf16.msra.mxu0 %v1819_v14  ;;  %v114_v51 = vpack.c.bf16 %v43_v45, %v43_v45  ;;  %1190 = vmatprep.mubr.bf16.mxu0 %v112_v50  ;;  %v1845_v55 = vld [vmem:[%s2413_s1 + $0x188] sm:$0xff]   ;;  %v1849_v59 = vld [vmem:[%s2413_s1 + $0x190] sm:$0xff]   ;;  %v1852_v62 = vld [vmem:[%s2413_s1 + $0x118] sm:$0xff]  }
  0x11   :  { %1656 = vmatpush3.bf16.msra.mxu1 %v1820_v15  ;;  %1635 = vmatprep.subr.bf16.mxu0 %v1821_v16  ;;  %v1853_v63 = vld [vmem:[%s2413_s1 + $0x198] sm:$0xff]   ;;  %v1854_v0 = vld [vmem:[%s2413_s1 + $0x160] sm:$0xff]   ;;  %v1858_v4 = vld [vmem:[%s2413_s1 + $0x168] sm:$0xff]  }
  0x12   :  { %1657 = vmatprep.subr.bf16.mxu1 %v1822_v17  ;;  %1230 = vmatprep.mubr.bf16.mxu1 %v114_v51  ;;  %v1855_v1 = vld [vmem:[%s2413_s1 + $0x1e0] sm:$0xff]   ;;  %v1859_v5 = vld [vmem:[%s2413_s1 + $0x1e8] sm:$0xff]   ;;  %v1862_v8 = vld [vmem:[%s2413_s1 + $0x170] sm:$0xff]  }
  0x13   :  { %v1856_v2 = vld [vmem:[%s2413_s1 + $0x120] sm:$0xff]   ;;  %v1860_v6 = vld [vmem:[%s2413_s1 + $0x128] sm:$0xff]   ;;  %v1863_v9 = vld [vmem:[%s2413_s1 + $0x1f0] sm:$0xff]  }
  0x14   :  { %1636 = vmatpush3.bf16.msra.mxu0 %v1823_v18  ;;  %v1857_v3 = vld [vmem:[%s2413_s1 + $0x1a0] sm:$0xff]   ;;  %v1861_v7 = vld [vmem:[%s2413_s1 + $0x1a8] sm:$0xff]   ;;  %v1864_v11 = vld [vmem:[%s2413_s1 + $0x130] sm:$0xff]  }
  0x15   :  { %1658 = vmatpush3.bf16.msra.mxu1 %v1824_v19  ;;  %1637 = vmatprep.subr.bf16.mxu0 %v1825_v20  ;;  %v20_v10 = vld [vmem:[%s2412_s0 + $0x8] sm:$0xff]  ;;  %v1865_v14 = vld [vmem:[%s2413_s1 + $0x1b0] sm:$0xff]   ;;  %v1866_v15 = vld [vmem:[%s2413_s1 + $0x178] sm:$0xff]  }
  0x16   :  { %1659 = vmatprep.subr.bf16.mxu1 %v1826_v21  ;;  %v51_v12 = vrot.slane %v20_v10, %v2093_v41  ;;  %v44_v13 = vcombine.high %v20_v10, %v20_v10  ;;  %v1867_v18 = vld [vmem:[%s2413_s1 + $0x1f8] sm:$0xff]   ;;  %v1878_v33 = vld [vmem:[%s2413_s1 + $0x288] sm:$0xff]   ;;  %v1879_v34 = vld [vmem:[%s2413_s1 + $0x250] sm:$0xff]  }
  0x17   :  { %v1868_v19 = vld [vmem:[%s2413_s1 + $0x138] sm:$0xff]   ;;  %v1881_v36 = vld [vmem:[%s2413_s1 + $0x210] sm:$0xff]   ;;  %v1887_v43 = vld [vmem:[%s2413_s1 + $0x260] sm:$0xff]  }
  0x18   :  { %1638 = vmatpush3.bf16.msra.mxu0 %v1827_v22  ;;  %v59_v16 = vcombine.high %v51_v12, %v51_v12  ;;  %v58_v17 = vrot.slane %v44_v13, %v2093_v41  ;;  %v1869_v22 = vld [vmem:[%s2413_s1 + $0x1b8] sm:$0xff]   ;;  %v1882_v37 = vld [vmem:[%s2413_s1 + $0x290] sm:$0xff]   ;;  %v1888_v44 = vld [vmem:[%s2413_s1 + $0x2e0] sm:$0xff]  }
  0x19   :  { %1660 = vmatpush3.bf16.msra.mxu1 %v1828_v23  ;;  %1639 = vmatprep.subr.bf16.mxu0 %v1829_v24  ;;  %v1871_v24 = vld [vmem:[%s2413_s1 + $0x240] sm:$0xff]   ;;  %v1884_v39 = vld [vmem:[%s2413_s1 + $0x2d8] sm:$0xff]   ;;  %v1894_v50 = vld [vmem:[%s2413_s1 + $0x2a8] sm:$0xff]  }
  0x1a   :  { %1661 = vmatprep.subr.bf16.mxu1 %v1830_v25  ;;  %v116_v20 = vpack.c.bf16 %v59_v16, %v59_v16  ;;  %v60_v21 = vcombine.high %v58_v17, %v58_v17  ;;  %v1872_v25 = vld [vmem:[%s2413_s1 + $0x2c0] sm:$0xff]   ;;  %v117_v28 = vpack.c.bf16 %v58_v17, %v58_v17  ;;  %v1885_v40 = vld [vmem:[%s2413_s1 + $0x218] sm:$0xff]   ;;  %v1895_v51 = vld [vmem:[%s2413_s1 + $0x270] sm:$0xff]  }
  0x1b   :  { %v1886_v42 = vld [vmem:[%s2413_s1 + $0x298] sm:$0xff]   ;;  %v1889_v45 = vld [vmem:[%s2413_s1 + $0x220] sm:$0xff]   ;;  %v1909_v10 = vld [vmem:[%s2413_s1 + $0x3c8] sm:$0xff]  }
  0x1c   :  { %1640 = vmatpush3.bf16.msra.mxu0 %v1831_v26  ;;  %v118_v23 = vpack.c.bf16 %v60_v21, %v60_v21  ;;  %v1873_v26 = vld [vmem:[%s2413_s1 + $0x200] sm:$0xff]   ;;  %v1912_v13 = vld [vmem:[%s2413_s1 + $0x350] sm:$0xff]   ;;  %v1916_v17 = vld [vmem:[%s2413_s1 + $0x358] sm:$0xff]  }
  0x1d   :  { %1662 = vmatpush3.bf16.msra.mxu1 %v1832_v27  ;;  %1641 = vmatprep.subr.bf16.mxu0 %v1833_v29  ;;  %v115_v27 = vpack.c.bf16 %v51_v12, %v51_v12  ;;  %v1874_v29 = vld [vmem:[%s2413_s1 + $0x280] sm:$0xff]   ;;  %v1911_v12 = vld [vmem:[%s2413_s1 + $0x388] sm:$0xff]   ;;  %v1915_v16 = vld [vmem:[%s2413_s1 + $0x390] sm:$0xff]  }
  0x1e   :  { %1663 = vmatprep.subr.bf16.mxu1 %v1834_v30  ;;  %v1875_v30 = vld [vmem:[%s2413_s1 + $0x248] sm:$0xff]   ;;  %v1920_v21 = vld [vmem:[%s2413_s1 + $0x360] sm:$0xff]  }
  0x20   :  { %1642 = vmatpush3.bf16.msra.mxu0 %v1835_v31  ;;  %v1876_v31 = vld [vmem:[%s2413_s1 + $0x2c8] sm:$0xff]  }
  0x21   :  { %1664 = vmatpush3.bf16.msra.mxu1 %v1836_v32  ;;  %1671 = vmatprep.subr.bf16.mxu0 %v1838_v35  ;;  %v1877_v32 = vld [vmem:[%s2413_s1 + $0x208] sm:$0xff]   ;;  %v1880_v35 = vld [vmem:[%s2413_s1 + $0x2d0] sm:$0xff]  }
  0x22   :  { %1693 = vmatprep.subr.bf16.mxu1 %v1839_v38  ;;  %v1883_v38 = vld [vmem:[%s2413_s1 + $0x258] sm:$0xff]  }
  0x23   :  { %1191 = vmatmul.mubr.bf16.vlgmr.msra.gmra.mrb[0].mxu0 %v111_v47  ;;  %v1891_v47 = vld [vmem:[%s2413_s1 + $0x268] sm:$0xff]  }
  0x24   :  { %1231 = vmatmul.mubr.bf16.vlgmr.msra.gmra.mrb[0].mxu1 %v113_v48  ;;  %1672 = vmatpush3.bf16.msra.mxu0 %v1840_v46  ;;  %v1890_v46 = vld [vmem:[%s2413_s1 + $0x2a0] sm:$0xff]   ;;  %v1892_v48 = vld [vmem:[%s2413_s1 + $0x2e8] sm:$0xff]  }
  0x25   :  { %1694 = vmatpush3.bf16.msra.mxu1 %v1841_v49  ;;  %1673 = vmatprep.subr.bf16.mxu0 %v1842_v52  ;;  %v1893_v49 = vld [vmem:[%s2413_s1 + $0x228] sm:$0xff]   ;;  %v1896_v52 = vld [vmem:[%s2413_s1 + $0x2f0] sm:$0xff]  }
  0x26   :  { %1695 = vmatprep.subr.bf16.mxu1 %v1843_v53  ;;  %1270 = vmatprep.mubr.bf16.mxu0 %v116_v20  ;;  %v21_v53 = vld [vmem:[%s2412_s0 + $0x10] sm:$0xff]  ;;  %v1919_v20 = vld [vmem:[%s2413_s1 + $0x398] sm:$0xff]  }
  0x27   :  { %1310 = vmatprep.mubr.bf16.mxu1 %v118_v23  ;;  %v1922_v23 = vld [vmem:[%s2413_s1 + $0x320] sm:$0xff]  }
  0x28   :  { %1674 = vmatpush3.bf16.msra.mxu0 %v1844_v54  ;;  %v1897_v54 = vld [vmem:[%s2413_s1 + $0x230] sm:$0xff]  }
  0x29   :  { %1696 = vmatpush3.bf16.msra.mxu1 %v1845_v55  ;;  %1675 = vmatprep.subr.bf16.mxu0 %v1846_v56  ;;  %v68_v55 = vrot.slane %v21_v53, %v2093_v41  ;;  %v61_v56 = vcombine.high %v21_v53, %v21_v53 }
  0x2a   :  { %1697 = vmatprep.subr.bf16.mxu1 %v1847_v57  ;;  %v1898_v57 = vld [vmem:[%s2413_s1 + $0x2b0] sm:$0xff]  }
  0x2c   :  { %1676 = vmatpush3.bf16.msra.mxu0 %v1848_v58  ;;  %v1899_v58 = vld [vmem:[%s2413_s1 + $0x278] sm:$0xff]  }
  0x2d   :  { %1698 = vmatpush3.bf16.msra.mxu1 %v1849_v59  ;;  %1677 = vmatprep.subr.bf16.mxu0 %v1850_v60  ;;  %v76_v59 = vcombine.high %v68_v55, %v68_v55  ;;  %v75_v60 = vrot.slane %v61_v56, %v2093_v41 }
  0x2e   :  { %1699 = vmatprep.subr.bf16.mxu1 %v1851_v61  ;;  %v1900_v61 = vld [vmem:[%s2413_s1 + $0x2f8] sm:$0xff]  }
  0x30   :  { %1678 = vmatpush3.bf16.msra.mxu0 %v1852_v62  ;;  %v1901_v62 = vld [vmem:[%s2413_s1 + $0x238] sm:$0xff]  }
  0x31   :  { %1700 = vmatpush3.bf16.msra.mxu1 %v1853_v63  ;;  %1679 = vmatprep.subr.bf16.mxu0 %v1854_v0  ;;  %v120_v63 = vpack.c.bf16 %v76_v59, %v76_v59  ;;  %v77_v0 = vcombine.high %v75_v60, %v75_v60 }
  0x32   :  { %1701 = vmatprep.subr.bf16.mxu1 %v1855_v1  ;;  %v1902_v1 = vld [vmem:[%s2413_s1 + $0x2b8] sm:$0xff]  }
  0x34   :  { %1680 = vmatpush3.bf16.msra.mxu0 %v1856_v2  ;;  %v122_v2 = vpack.c.bf16 %v77_v0, %v77_v0 }
  0x35   :  { %1702 = vmatpush3.bf16.msra.mxu1 %v1857_v3  ;;  %1681 = vmatprep.subr.bf16.mxu0 %v1858_v4  ;;  %v1904_v3 = vld [vmem:[%s2413_s1 + $0x340] sm:$0xff]  }
  0x36   :  { %1703 = vmatprep.subr.bf16.mxu1 %v1859_v5  ;;  %v1905_v4 = vld [vmem:[%s2413_s1 + $0x3c0] sm:$0xff]  }
  0x37   :  { %v1906_v5 = vld [vmem:[%s2413_s1 + $0x300] sm:$0xff]  }
  0x38   :  { %1682 = vmatpush3.bf16.msra.mxu0 %v1860_v6  ;;  %v119_v6 = vpack.c.bf16 %v68_v55, %v68_v55 }
  0x39   :  { %1704 = vmatpush3.bf16.msra.mxu1 %v1861_v7  ;;  %1683 = vmatprep.subr.bf16.mxu0 %v1862_v8  ;;  %v121_v7 = vpack.c.bf16 %v75_v60, %v75_v60  ;;  %v1907_v8 = vld [vmem:[%s2413_s1 + $0x380] sm:$0xff]  }
  0x3a   :  { %1705 = vmatprep.subr.bf16.mxu1 %v1863_v9  ;;  %v1908_v9 = vld [vmem:[%s2413_s1 + $0x348] sm:$0xff]  }
  0x3c   :  { %1684 = vmatpush3.bf16.msra.mxu0 %v1864_v11  ;;  %v1910_v11 = vld [vmem:[%s2413_s1 + $0x308] sm:$0xff]  }
  0x3d   :  { %1706 = vmatpush3.bf16.msra.mxu1 %v1865_v14  ;;  %1685 = vmatprep.subr.bf16.mxu0 %v1866_v15  ;;  %v1913_v14 = vld [vmem:[%s2413_s1 + $0x3d0] sm:$0xff]  }
  0x3e   :  { %1707 = vmatprep.subr.bf16.mxu1 %v1867_v18  ;;  %v1914_v15 = vld [vmem:[%s2413_s1 + $0x310] sm:$0xff]   ;;  %v1917_v18 = vld [vmem:[%s2413_s1 + $0x3d8] sm:$0xff]  }
  0x40   :  { %1686 = vmatpush3.bf16.msra.mxu0 %v1868_v19  ;;  %v1918_v19 = vld [vmem:[%s2413_s1 + $0x318] sm:$0xff]  }
  0x41   :  { %1708 = vmatpush3.bf16.msra.mxu1 %v1869_v22  ;;  %1715 = vmatprep.subr.bf16.mxu0 %v1871_v24  ;;  %v1921_v22 = vld [vmem:[%s2413_s1 + $0x3e0] sm:$0xff]  }
  0x42   :  { %1737 = vmatprep.subr.bf16.mxu1 %v1872_v25  ;;  %v1923_v24 = vld [vmem:[%s2413_s1 + $0x3a0] sm:$0xff]   ;;  %v1924_v25 = vld [vmem:[%s2413_s1 + $0x368] sm:$0xff]  }
  0x43   :  { %1271 = vmatmul.mubr.bf16.vlgmr.msra.gmra.mrb[4].mxu0 %v115_v27  ;;  %v1926_v27 = vld [vmem:[%s2413_s1 + $0x328] sm:$0xff]  }
  0x44   :  { %1311 = vmatmul.mubr.bf16.vlgmr.msra.gmra.mrb[4].mxu1 %v117_v28  ;;  %1716 = vmatpush3.bf16.msra.mxu0 %v1873_v26  ;;  %v1925_v26 = vld [vmem:[%s2413_s1 + $0x3e8] sm:$0xff]  }
  0x45   :  { %1738 = vmatpush3.bf16.msra.mxu1 %v1874_v29  ;;  %1717 = vmatprep.subr.bf16.mxu0 %v1875_v30  ;;  %v1927_v28 = vld [vmem:[%s2413_s1 + $0x3a8] sm:$0xff]   ;;  %v1928_v29 = vld [vmem:[%s2413_s1 + $0x370] sm:$0xff]  }
  0x46   :  { %1739 = vmatprep.subr.bf16.mxu1 %v1876_v31  ;;  %1350 = vmatprep.mubr.bf16.mxu0 %v120_v63  ;;  %v1929_v30 = vld [vmem:[%s2413_s1 + $0x3f0] sm:$0xff]   ;;  %v22_v31 = vld [vmem:[%s2412_s0 + $0x18] sm:$0xff] }
  0x47   :  { %1390 = vmatprep.mubr.bf16.mxu1 %v122_v2 }
  0x48   :  { %1718 = vmatpush3.bf16.msra.mxu0 %v1877_v32 }
  0x49   :  { %1740 = vmatpush3.bf16.msra.mxu1 %v1878_v33  ;;  %1719 = vmatprep.subr.bf16.mxu0 %v1879_v34 }
  0x4a   :  { %1741 = vmatprep.subr.bf16.mxu1 %v1880_v35 }
  0x4c   :  { %1720 = vmatpush3.bf16.msra.mxu0 %v1881_v36 }
  0x4d   :  { %1742 = vmatpush3.bf16.msra.mxu1 %v1882_v37  ;;  %1721 = vmatprep.subr.bf16.mxu0 %v1883_v38 }
  0x4e   :  { %1743 = vmatprep.subr.bf16.mxu1 %v1884_v39 }
  0x50   :  { %1722 = vmatpush3.bf16.msra.mxu0 %v1885_v40 }
  0x51   :  { %1744 = vmatpush3.bf16.msra.mxu1 %v1886_v42  ;;  %1723 = vmatprep.subr.bf16.mxu0 %v1887_v43 }
  0x52   :  { %1745 = vmatprep.subr.bf16.mxu1 %v1888_v44 }
  0x54   :  { %1724 = vmatpush3.bf16.msra.mxu0 %v1889_v45 }
  0x55   :  { %1746 = vmatpush3.bf16.msra.mxu1 %v1890_v46  ;;  %1725 = vmatprep.subr.bf16.mxu0 %v1891_v47 }
  0x56   :  { %1747 = vmatprep.subr.bf16.mxu1 %v1892_v48 }
  0x58   :  { %1726 = vmatpush3.bf16.msra.mxu0 %v1893_v49 }
  0x59   :  { %1748 = vmatpush3.bf16.msra.mxu1 %v1894_v50  ;;  %1727 = vmatprep.subr.bf16.mxu0 %v1895_v51 }
  0x5a   :  { %1749 = vmatprep.subr.bf16.mxu1 %v1896_v52 }
  0x5c   :  { %1728 = vmatpush3.bf16.msra.mxu0 %v1897_v54 }
  0x5d   :  { %1750 = vmatpush3.bf16.msra.mxu1 %v1898_v57  ;;  %1729 = vmatprep.subr.bf16.mxu0 %v1899_v58 }
  0x5e   :  { %1751 = vmatprep.subr.bf16.mxu1 %v1900_v61 }
  0x60   :  { %1730 = vmatpush3.bf16.msra.mxu0 %v1901_v62 }
  0x61   :  { %1752 = vmatpush3.bf16.msra.mxu1 %v1902_v1  ;;  %1759 = vmatprep.subr.bf16.mxu0 %v1904_v3 }
  0x62   :  { %1781 = vmatprep.subr.bf16.mxu1 %v1905_v4 }
  0x63   :  { %1351 = vmatmul.mubr.bf16.vlgmr.msra.gmra.mrb[8].mxu0 %v119_v6 }
  0x64   :  { %1391 = vmatmul.mubr.bf16.vlgmr.msra.gmra.mrb[8].mxu1 %v121_v7  ;;  %1760 = vmatpush3.bf16.msra.mxu0 %v1906_v5 }
  0x65   :  { %1782 = vmatpush3.bf16.msra.mxu1 %v1907_v8  ;;  %1761 = vmatprep.subr.bf16.mxu0 %v1908_v9 }
  0x66   :  { %1783 = vmatprep.subr.bf16.mxu1 %v1909_v10 }
  0x68   :  { %1762 = vmatpush3.bf16.msra.mxu0 %v1910_v11 }
  0x69   :  { %1784 = vmatpush3.bf16.msra.mxu1 %v1911_v12  ;;  %1763 = vmatprep.subr.bf16.mxu0 %v1912_v13 }
  0x6a   :  { %1785 = vmatprep.subr.bf16.mxu1 %v1913_v14 }
  0x6c   :  { %1764 = vmatpush3.bf16.msra.mxu0 %v1914_v15 }
  0x6d   :  { %1786 = vmatpush3.bf16.msra.mxu1 %v1915_v16  ;;  %1765 = vmatprep.subr.bf16.mxu0 %v1916_v17 }
  0x6e   :  { %1787 = vmatprep.subr.bf16.mxu1 %v1917_v18 }
  0x70   :  { %1766 = vmatpush3.bf16.msra.mxu0 %v1918_v19 }
  0x71   :  { %1788 = vmatpush3.bf16.msra.mxu1 %v1919_v20  ;;  %1767 = vmatprep.subr.bf16.mxu0 %v1920_v21 }
  0x72   :  { %1789 = vmatprep.subr.bf16.mxu1 %v1921_v22 }
  0x74   :  { %1768 = vmatpush3.bf16.msra.mxu0 %v1922_v23 }
  0x75   :  { %1790 = vmatpush3.bf16.msra.mxu1 %v1923_v24  ;;  %1769 = vmatprep.subr.bf16.mxu0 %v1924_v25 }
  0x76   :  { %1791 = vmatprep.subr.bf16.mxu1 %v1925_v26 }
  0x77   :  { %9 = vsyncpa [#allocation3], 0  ;;  %v85_v32 = vrot.slane %v22_v31, %v2093_v41  ;;  %v78_v33 = vcombine.high %v22_v31, %v22_v31  ;;  %v1930_v34 = vld [vmem:[%s2413_s1 + $0x330] sm:$0xff]   ;;  %v1932_v36 = vld [vmem:[%s2413_s1 + $0x378] sm:$0xff]   ;;  %s1962_s20 = smov [#allocation2]  }
  0x78   :  { %1770 = vmatpush3.bf16.msra.mxu0 %v1926_v27  ;;  %v1931_v35 = vld [vmem:[%s2413_s1 + $0x3b0] sm:$0xff]   ;;  %v1933_v37 = vld [vmem:[%s2413_s1 + $0x3f8] sm:$0xff]   ;;  %v1498_v49 = vld [vmem:[%s2414_s2] ss:$0 sm:$0xff]  ;;  %s1490_s21 = sshll.u32 %s1962_s20, 4  ;;  %s1491_s21 = int_to_ptr.vmem [resolvable:$true] %s1490_s21 }
  0x79   :  { %1792 = vmatpush3.bf16.msra.mxu1 %v1927_v28  ;;  %1771 = vmatprep.subr.bf16.mxu0 %v1928_v29  ;;  %v93_v38 = vcombine.high %v85_v32, %v85_v32  ;;  %v92_v39 = vrot.slane %v78_v33, %v2093_v41  ;;  %v1934_v43 = vld [vmem:[%s2413_s1 + $0x338] sm:$0xff]   ;;  %v123_v46 = vpack.c.bf16 %v85_v32, %v85_v32  ;;  %v1479_v32 = vld [vmem:[%s2415_s3] sm:$0x3]  ;;  %s1937_s22 = scalar_lea.vmem %s1491_s21, 32  ;;  %p1942_p1 = scmp.lt.s32.totalorder %s1491_s21, %s1491_s21 }
  0x7a   :  { %1793 = vmatprep.subr.bf16.mxu1 %v1929_v30  ;;  %v1935_v44 = vld [vmem:[%s2413_s1 + $0x3b8] sm:$0xff]   ;;  %vm1480_vm0 = vcmp.lt.f32.partialorder %v1479_v32, 0.5  ;;  %p1938_p0 = scmp.ne.s32.totalorder %s1491_s21, %s1937_s22  ;;  %p1943_p2 = scmp.lt.s32.totalorder %s1937_s22, %s1937_s22 }
  0x7b   :  { %v124_v40 = vpack.c.bf16 %v93_v38, %v93_v38  ;;  %v94_v42 = vcombine.high %v92_v39, %v92_v39  ;;  %v125_v47 = vpack.c.bf16 %v92_v39, %v92_v39 }
  0x7c   :  { %1772 = vmatpush3.bf16.msra.mxu0 %v1930_v34  ;;  %p1944_p3 = por %p1943_p2, %p1942_p1 }
  0x7d   :  { %1794 = vmatpush3.bf16.msra.mxu1 %v1931_v35  ;;  %1773 = vmatprep.subr.bf16.mxu0 %v1932_v36  ;;  %v126_v45 = vpack.c.bf16 %v94_v42, %v94_v42 }
  0x7e   :  { %1795 = vmatprep.subr.bf16.mxu1 %v1933_v37  ;;  %1430 = vmatprep.mubr.bf16.mxu0 %v124_v40  ;;  %p1945_p4 = pnand %p1944_p3, %p1938_p0 }
  0x7f   :  { %1470 = vmatprep.mubr.bf16.mxu1 %v126_v45 }
  0x80   :  { %1774 = vmatpush3.bf16.msra.mxu0 %v1934_v43 }
  0x81   :  { %1796 = vmatpush3.bf16.msra.mxu1 %v1935_v44 }
  0x83   :  { %1431 = vmatmul.mubr.bf16.vlgmr.msra.gmra.mrb[12].mxu0 %v123_v46 }
  0x84   :  { %1471 = vmatmul.mubr.bf16.vlgmr.msra.gmra.mrb[12].mxu1 %v125_v47 }
  0xf6   :  { %v1643_v41 = vpop.f32.mrb[0].mxu0 }
  0xf7   :  { %v1665_v48 = vpop.f32.mrb[0].mxu1  ;;  %v1644_v50 = vpop.f32.mrb[1].mxu0 }
  0xf8   :  { %v1666_v51 = vpop.f32.mrb[1].mxu1  ;;  %v1645_v52 = vadd.f32 %v1644_v50, %v1643_v41  ;;  %v1646_v54 = vpop.f32.mrb[2].mxu0 }
  0xf9   :  { %v1667_v53 = vadd.f32 %v1666_v51, %v1665_v48  ;;  %v1668_v55 = vpop.f32.mrb[2].mxu1  ;;  %v1647_v56 = vpop.f32.mrb[3].mxu0 }
  0xfa   :  { %v1669_v57 = vpop.f32.mrb[3].mxu1  ;;  %v1193_v58 = vadd.f32 %v1645_v52, %v1498_v49 }
  0xfc   :  { %v1233_v59 = vadd.f32 %v1667_v53, %v1193_v58 }
 0x116   :  { %v1687_v60 = vpop.f32.mrb[4].mxu0 }
 0x117   :  { %v1709_v61 = vpop.f32.mrb[4].mxu1  ;;  %v1688_v62 = vpop.f32.mrb[5].mxu0 }
 0x118   :  { %v1710_v63 = vpop.f32.mrb[5].mxu1  ;;  %v1689_v0 = vadd.f32 %v1688_v62, %v1687_v60  ;;  %v1690_v2 = vpop.f32.mrb[6].mxu0 }
 0x119   :  { %v1711_v1 = vadd.f32 %v1710_v63, %v1709_v61  ;;  %v1712_v3 = vpop.f32.mrb[6].mxu1  ;;  %v1691_v4 = vpop.f32.mrb[7].mxu0 }
 0x11a   :  { %v1713_v5 = vpop.f32.mrb[7].mxu1  ;;  %v1273_v6 = vadd.f32 %v1689_v0, %v1233_v59 }
 0x11c   :  { %v1313_v7 = vadd.f32 %v1711_v1, %v1273_v6 }
 0x136   :  { %v1731_v8 = vpop.f32.mrb[8].mxu0 }
 0x137   :  { %v1753_v9 = vpop.f32.mrb[8].mxu1  ;;  %v1732_v10 = vpop.f32.mrb[9].mxu0 }
 0x138   :  { %v1754_v11 = vpop.f32.mrb[9].mxu1  ;;  %v1733_v12 = vadd.f32 %v1732_v10, %v1731_v8  ;;  %v1734_v14 = vpop.f32.mrb[10].mxu0 }
 0x139   :  { %v1755_v13 = vadd.f32 %v1754_v11, %v1753_v9  ;;  %v1756_v15 = vpop.f32.mrb[10].mxu1  ;;  %v1735_v16 = vpop.f32.mrb[11].mxu0 }
 0x13a   :  { %v1757_v17 = vpop.f32.mrb[11].mxu1  ;;  %v1353_v18 = vadd.f32 %v1733_v12, %v1313_v7 }
 0x13c   :  { %v1393_v19 = vadd.f32 %v1755_v13, %v1353_v18 }
 0x156   :  { %v1775_v20 = vpop.f32.mrb[12].mxu0 }
 0x157   :  { %v1797_v21 = vpop.f32.mrb[12].mxu1  ;;  %v1776_v22 = vpop.f32.mrb[13].mxu0 }
 0x158   :  { %v1798_v23 = vpop.f32.mrb[13].mxu1  ;;  %v1777_v24 = vadd.f32 %v1776_v22, %v1775_v20  ;;  %v1778_v26 = vpop.f32.mrb[14].mxu0 }
 0x159   :  { %v1799_v25 = vadd.f32 %v1798_v23, %v1797_v21  ;;  %v1800_v27 = vpop.f32.mrb[14].mxu1  ;;  %v1779_v28 = vpop.f32.mrb[15].mxu0 }
 0x15a   :  { %v1801_v29 = vpop.f32.mrb[15].mxu1  ;;  %v1433_v30 = vadd.f32 %v1777_v24, %v1393_v19 }
 0x15c   :  { %v1473_v31 = vadd.f32 %v1799_v25, %v1433_v30 }
 0x15e   :  { %v1478_v33 = vmax.f32 %v1473_v31, 0.0 }
 0x160   :  { %v1481_v34 = vmul.f32 2.0, %v1478_v33 }
 0x162   :  { %v1482_v35 = vsel %vm1480_vm0, 0.0, %v1481_v34 }
 0x163   :  { %1483 = vst [vmem:[#allocation2] sm:$0x3] %v1482_v35 }
 0x164   :  { %1948 = shalt.err (!%p1945_p4)
}
 0x165   :  { %s1949_s25 = scalar_lea.hbm %s2416_s4, 32 }
 0x166   :  { %p1950_p5 = scmp.ne.s32.totalorder %s2416_s4, %s1949_s25  ;;  %p1953_p6 = scmp.lt.u32.totalorder %s1949_s25, %s2416_s4 }
 0x168   :  { %p1955_p7 = pnand %p1953_p6, %p1950_p5 }
 0x16a   :  { %1958 = shalt.err (!%p1955_p7)
}
 0x16b   :  { %1493 = dma.vmem_to_hbm [thread:$0]  %s1491_s21, 32, %s2416_s4, [#allocation3]  }
 0x16c   :  { %1959 = dma.done.wait [#allocation3], 32  }
 0x16d   :  { %1960 = vsyncadd [#allocation3], 4294967264 }
 0x16e   :  { %1497 = vsyncpa [#allocation3], 1 }

// kernel: encoder_forward.2
= control target key start
LH: loop header
LB: loop body
LE: loop exit
PB: predicated region body
PF: predicated region fallthrough
CT: control target
= control target key end

     0   :  { %s3312_s12 = smov 0   ;;  %s3314_s13 = smov 0   ;;  %s3940_s0 = inlined_call_operand.vmem [shape: bf16[512,32], index: 0, kind: input, shape index: {}]   ;;  %s3941_s1 = inlined_call_operand.vmem [shape: bf16[32,128], index: 1, kind: input, shape index: {}]   ;;  %s3942_s2 = inlined_call_operand.vmem [shape: bf16[128,2048], index: 2, kind: input, shape index: {}]   ;;  %s3943_s3 = inlined_call_operand.vmem [shape: f32[2,1,2048], index: 3, kind: output, shape index: {}]  }
   0x1   :  { %s3316_s14 = smov 0   ;;  %s3318_s15 = smov 0  }
   0x2   :  { %s3320_s16 = smov 0  }
   0x3 LB: > { %s22_s17 = sadd.s32 1, %s3278_s14  ;;  %s25_s18 = sadd.s32 1, %s3282_s15  ;;  %s3286_s16 = sphi %s3320_s16, %s13_s16   ;;  %s3282_s15 = sphi %s3318_s15, %s3947_s15   ;;  %s3278_s14 = sphi %s3316_s14, %s3946_s14   ;;  %s3274_s13 = sphi %s3314_s13, %s3945_s13   ;;  %s3270_s12 = sphi %s3312_s12, %s3944_s12  }
   0x4   : > { %p23_p0 = scmp.ge.s32.totalorder %s22_s17, 2  ;;  %p3009_p1 = scmp.ge.s32.totalorder %s3286_s16, 1 }
   0x5   : > { %p158_p2 = scmp.lt.s32.totalorder %s3286_s16, 5 }
   0x6   : > { %s3949_s17 = smov (%p23_p0, %s22_s17), 0  ;;  %s3951_s18 = smov (!%p23_p0, %s25_s18), %s3282_s15 }
   0x7   : > { %p159_p3 = pnand %p3009_p1, %p158_p2  ;;  %p27_p4 = scmp.ge.s32.totalorder %s3951_s18, 2 }
   0x8   : > { %s3010_s19 = sshll.u32 (!%p159_p3), %s3274_s13, 1  ;;  %p193_p5 = scmp.lt.s32.totalorder (!%p159_p3), %s3274_s13, 1 }
   0x9   : > { %s3953_s18 = smov (%p27_p4, %s3951_s18), 0  ;;  %162 = sbr.rel (%p159_p3) target bundleno = 961 (0x3c1), region = 32 }
   0xa   : > { %s184_s20 = sadd.s32 (!%p159_p3), %s3270_s12, %s3010_s19  ;;  %p3014_p7 = scmp.ne.s32.totalorder (!%p159_p3), %s3270_s12, 0 }
   0xb   : > { %s3011_s21 = sshll.u32 (!%p159_p3), %s184_s20, 4 }
   0xc   : > { %p186_p6 = scmp.lt.s32.totalorder (!%p159_p3), %s3011_s21, 63 }
  0x10   : > { %s3955_s13 = smov (!%p193_p5, %s3274_s13), 1  ;;  %s3957_s21 = smov (!%p186_p6, %s3011_s21), 63 }
  0x11   : > { %s3013_s22 = sshll.u32 %s3955_s13, 4  ;;  %s3012_s23 = sshll.u32 %s3957_s21, 2  ;;  %v3288_v0 = vmov (!%p3014_p7), 0.0  }
  0x12   : > { %s3348_s26 = scalar_lea.vmem %s3943_s3, %s3013_s22  ;;  %s3353_s29 = scalar_lea.vmem %s3940_s0, %s3012_s23  ;;  %203 = vst [vmem:[#allocation2] sm:$0xff] (!%p3014_p7), %v3288_v0  ;;  %204 = vst [vmem:[#allocation2 + $0x8] sm:$0xff] (!%p3014_p7), %v3288_v0 }
  0x13   : > { %202 = sbr.rel (%p3014_p7) target bundleno = 26 (0x1a), region = 36 }
  0x1a PF: > { %v3238_v1 = vld [vmem:[%s3941_s1] sm:$0xff]   ;;  %v3239_v2 = vld [vmem:[%s3941_s1 + $0x8] sm:$0xff]   ;;  %vm277_vm0 = vcmask 261120   ;;  %v3242_v5 = vld [vmem:[%s3353_s29 + $0x10] sm:$0xff]   ;;  %p3161_p8 = scmp.ne.s32.totalorder %s3270_s12, 1 }
  0x1b   : > { %3174 = vmatprep.subr.bf16.mxu0 %v3238_v1  ;;  %v3240_v3 = vld [vmem:[%s3353_s29] sm:$0xff]   ;;  %v3241_v4 = vld [vmem:[%s3353_s29 + $0x8] sm:$0xff]   ;;  %v3243_v24 = vld [vmem:[%s3353_s29 + $0x18] sm:$0xff]  }
  0x1c   : > { %3175 = vmatpush3.bf16.msra.mxu0 %v3238_v1  ;;  %3178 = vmatprep.mubr.msk.bf16.mxu0 %vm277_vm0, %v3240_v3  ;;  %v423_v6 = vld [vmem:[%s3942_s2] sm:$0xff]  ;;  %v424_v8 = vld [vmem:[%s3942_s2 + $0x8] sm:$0xff]  ;;  %v3246_v44 = vld [vmem:[%s3353_s29 + $0x30] sm:$0xff]  }
  0x1d   : > { %3176 = vmatprep.subr.bf16.mxu0 %v3239_v2  ;;  %v431_v7 = vld [vmem:[%s3942_s2 + $0x40] sm:$0xff]  ;;  %v432_v10 = vld [vmem:[%s3942_s2 + $0x48] sm:$0xff]  ;;  %v3247_v60 = vld [vmem:[%s3353_s29 + $0x38] sm:$0xff]  }
  0x1e   : > { %v3034_v9 = vcombine.high %v423_v6, %v431_v7  ;;  %v3033_v11 = vcombine.low %v423_v6, %v431_v7  ;;  %v439_v12 = vld [vmem:[%s3942_s2 + $0x80] sm:$0xff]  ;;  %v3035_v14 = vcombine.low %v424_v8, %v432_v10  ;;  %v3036_v15 = vcombine.high %v424_v8, %v432_v10  ;;  %v440_v17 = vld [vmem:[%s3942_s2 + $0x88] sm:$0xff] }
  0x1f   : > { %v447_v13 = vld [vmem:[%s3942_s2 + $0xc0] sm:$0xff]  ;;  %v448_v18 = vld [vmem:[%s3942_s2 + $0xc8] sm:$0xff] }
  0x20   : > { %3177 = vmatpush3.bf16.msra.mxu0 %v3239_v2  ;;  %v3050_v16 = vcombine.high %v439_v12, %v447_v13  ;;  %v455_v19 = vld [vmem:[%s3942_s2 + $0x100] sm:$0xff]  ;;  %1191 = vmatprep.subr.bf16.mxu1 %v3034_v9  ;;  %v3052_v20 = vcombine.high %v440_v17, %v448_v18  ;;  %v456_v22 = vld [vmem:[%s3942_s2 + $0x108] sm:$0xff]  ;;  %v3049_v25 = vcombine.low %v439_v12, %v447_v13  ;;  %v433_v12 = vld [vmem:[%s3942_s2 + $0x50] sm:$0xff] }
  0x21   : > { %v463_v21 = vld [vmem:[%s3942_s2 + $0x140] sm:$0xff]  ;;  %v464_v23 = vld [vmem:[%s3942_s2 + $0x148] sm:$0xff]  ;;  %1304 = vmatprep.subr.bf16.mxu0 %v3036_v15  ;;  %1192 = vmatpush1.bf16.msra.mxu1 %v3033_v11  ;;  %v3051_v27 = vcombine.low %v440_v17, %v448_v18  ;;  %v425_v11 = vld [vmem:[%s3942_s2 + $0x10] sm:$0xff] }
  0x22   : > { %v3244_v26 = vld [vmem:[%s3353_s29 + $0x20] sm:$0xff]   ;;  %1193 = vmatprep.subr.bf16.mxu1 %v3050_v16  ;;  %v3066_v28 = vcombine.high %v455_v19, %v463_v21  ;;  %v3068_v29 = vcombine.high %v456_v22, %v464_v23  ;;  %v472_v32 = vld [vmem:[%s3942_s2 + $0x188] sm:$0xff]  ;;  %v3065_v34 = vcombine.low %v455_v19, %v463_v21  ;;  %v3067_v35 = vcombine.low %v456_v22, %v464_v23  ;;  %v426_v13 = vld [vmem:[%s3942_s2 + $0x18] sm:$0xff] }
  0x23   : > { %3179 = vmatmul.mubr.msk.bf16.vlgmr.msra.gmra.mrb[0].mxu0 %vm277_vm0, %v3241_v4  ;;  %v471_v30 = vld [vmem:[%s3942_s2 + $0x180] sm:$0xff]  ;;  %v480_v33 = vld [vmem:[%s3942_s2 + $0x1c8] sm:$0xff]  ;;  %v3037_v15 = vcombine.low %v425_v11, %v433_v12  ;;  %v3038_v16 = vcombine.high %v425_v11, %v433_v12  ;;  %v434_v17 = vld [vmem:[%s3942_s2 + $0x58] sm:$0xff] }
  0x24   : > { %3182 = vmatprep.mubr.msk.bf16.mxu0 %vm277_vm0, %v3242_v5  ;;  %1305 = vmatpush1.bf16.msra.mxu0 %v3035_v14  ;;  %v479_v31 = vld [vmem:[%s3942_s2 + $0x1c0] sm:$0xff]  ;;  %v3084_v37 = vcombine.high %v472_v32, %v480_v33  ;;  %v488_v40 = vld [vmem:[%s3942_s2 + $0x208] sm:$0xff]  ;;  %v3083_v45 = vcombine.low %v472_v32, %v480_v33  ;;  %v3289_v14 = vmov 0   ;;  %v3039_v18 = vcombine.low %v426_v13, %v434_v17 }
  0x25   : > { %1306 = vmatprep.subr.bf16.mxu0 %v3052_v20  ;;  %1194 = vmatpush1.bf16.msra.mxu1 %v3049_v25  ;;  %v3082_v36 = vcombine.high %v471_v30, %v479_v31  ;;  %v487_v38 = vld [vmem:[%s3942_s2 + $0x200] sm:$0xff]  ;;  %v496_v41 = vld [vmem:[%s3942_s2 + $0x248] sm:$0xff]  ;;  %v3081_v43 = vcombine.low %v471_v30, %v479_v31  ;;  %v3040_v19 = vcombine.high %v426_v13, %v434_v17  ;;  %v442_v30 = vld [vmem:[%s3942_s2 + $0x98] sm:$0xff] }
  0x26   : > { %1195 = vmatprep.subr.bf16.mxu1 %v3066_v28  ;;  %v495_v39 = vld [vmem:[%s3942_s2 + $0x240] sm:$0xff]  ;;  %v3245_v42 = vld [vmem:[%s3353_s29 + $0x28] sm:$0xff]   ;;  %v3100_v47 = vcombine.high %v488_v40, %v496_v41  ;;  %v3099_v53 = vcombine.low %v488_v40, %v496_v41  ;;  %1223 = vmatprep.mubr.bf16.mxu1 %v3289_v14  ;;  %v450_v31 = vld [vmem:[%s3942_s2 + $0xd8] sm:$0xff] }
  0x27   : > { %v3098_v46 = vcombine.high %v487_v38, %v495_v39  ;;  %v503_v48 = vld [vmem:[%s3942_s2 + $0x280] sm:$0xff]  ;;  %v504_v50 = vld [vmem:[%s3942_s2 + $0x288] sm:$0xff]  ;;  %v3097_v52 = vcombine.low %v487_v38, %v495_v39  ;;  %v458_v38 = vld [vmem:[%s3942_s2 + $0x118] sm:$0xff] }
  0x28   : > { %1307 = vmatpush1.bf16.msra.mxu0 %v3051_v27  ;;  %v511_v49 = vld [vmem:[%s3942_s2 + $0x2c0] sm:$0xff]  ;;  %v512_v51 = vld [vmem:[%s3942_s2 + $0x2c8] sm:$0xff]  ;;  %v466_v39 = vld [vmem:[%s3942_s2 + $0x158] sm:$0xff] }
  0x29   : > { %1308 = vmatprep.subr.bf16.mxu0 %v3068_v29  ;;  %1196 = vmatpush1.bf16.msra.mxu1 %v3065_v34  ;;  %v3114_v54 = vcombine.high %v503_v48, %v511_v49  ;;  %v3116_v55 = vcombine.high %v504_v50, %v512_v51  ;;  %v519_v56 = vld [vmem:[%s3942_s2 + $0x300] sm:$0xff]  ;;  %v520_v58 = vld [vmem:[%s3942_s2 + $0x308] sm:$0xff]  ;;  %v3113_v61 = vcombine.low %v503_v48, %v511_v49  ;;  %v449_v29 = vld [vmem:[%s3942_s2 + $0xd0] sm:$0xff] }
  0x2a   : > { %1197 = vmatprep.subr.bf16.mxu1 %v3082_v36  ;;  %v527_v57 = vld [vmem:[%s3942_s2 + $0x340] sm:$0xff]  ;;  %v528_v59 = vld [vmem:[%s3942_s2 + $0x348] sm:$0xff]  ;;  %v3115_v62 = vcombine.low %v504_v50, %v512_v51  ;;  %v457_v34 = vld [vmem:[%s3942_s2 + $0x110] sm:$0xff]  ;;  %v3056_v36 = vcombine.high %v442_v30, %v450_v31  ;;  %v3072_v48 = vcombine.high %v458_v38, %v466_v39 }
  0x2b   : > { %3183 = vmatmul.mubr.msk.bf16.gmra.mrb[4].mxu0 %vm277_vm0, %v3243_v24  ;;  %v3130_v63 = vcombine.high %v519_v56, %v527_v57  ;;  %v3132_v0 = vcombine.high %v520_v58, %v528_v59  ;;  %v3131_v1 = vcombine.low %v520_v58, %v528_v59  ;;  %v3129_v2 = vcombine.low %v519_v56, %v527_v57  ;;  %v535_v3 = vld [vmem:[%s3942_s2 + $0x380] sm:$0xff]  ;;  %v536_v5 = vld [vmem:[%s3942_s2 + $0x388] sm:$0xff]  ;;  %v473_v51 = vld [vmem:[%s3942_s2 + $0x190] sm:$0xff] }
  0x2c   : > { %3186 = vmatprep.mubr.msk.bf16.mxu0 %vm277_vm0, %v3244_v26  ;;  %1309 = vmatpush1.bf16.msra.mxu0 %v3067_v35  ;;  %v543_v4 = vld [vmem:[%s3942_s2 + $0x3c0] sm:$0xff]  ;;  %v544_v7 = vld [vmem:[%s3942_s2 + $0x3c8] sm:$0xff]  ;;  %v441_v26 = vld [vmem:[%s3942_s2 + $0x90] sm:$0xff]  ;;  %v3071_v59 = vcombine.low %v458_v38, %v466_v39 }
  0x2d   : > { %1310 = vmatprep.subr.bf16.mxu0 %v3084_v37  ;;  %1198 = vmatpush1.bf16.msra.mxu1 %v3081_v43  ;;  %v3146_v6 = vcombine.high %v535_v3, %v543_v4  ;;  %v3147_v8 = vcombine.low %v536_v5, %v544_v7  ;;  %v3148_v9 = vcombine.high %v536_v5, %v544_v7  ;;  %v465_v37 = vld [vmem:[%s3942_s2 + $0x150] sm:$0xff]  ;;  %v506_v17 = vld [vmem:[%s3942_s2 + $0x298] sm:$0xff] }
  0x2e   : > { %1199 = vmatprep.subr.bf16.mxu1 %v3098_v46  ;;  %v3145_v10 = vcombine.low %v535_v3, %v543_v4  ;;  %v3054_v35 = vcombine.high %v441_v26, %v449_v29  ;;  %v3053_v43 = vcombine.low %v441_v26, %v449_v29  ;;  %v3069_v58 = vcombine.low %v457_v34, %v465_v37  ;;  %v505_v13 = vld [vmem:[%s3942_s2 + $0x290] sm:$0xff]  ;;  %v530_v29 = vld [vmem:[%s3942_s2 + $0x358] sm:$0xff] }
  0x30   : > { %1311 = vmatpush1.bf16.msra.mxu0 %v3083_v45 }
  0x31   : > { %1312 = vmatprep.subr.bf16.mxu0 %v3100_v47  ;;  %1200 = vmatpush1.bf16.msra.mxu1 %v3097_v52  ;;  %v3070_v47 = vcombine.high %v457_v34, %v465_v37 }
  0x32   : > { %1201 = vmatprep.subr.bf16.mxu1 %v3114_v54  ;;  %v474_v54 = vld [vmem:[%s3942_s2 + $0x198] sm:$0xff] }
  0x33   : > { %3187 = vmatmul.mubr.msk.bf16.gmra.mrb[8].mxu0 %vm277_vm0, %v3245_v42 }
  0x34   : > { %3190 = vmatprep.mubr.msk.bf16.mxu0 %vm277_vm0, %v3246_v44  ;;  %1313 = vmatpush1.bf16.msra.mxu0 %v3099_v53  ;;  %v3055_v44 = vcombine.low %v442_v30, %v450_v31  ;;  %v481_v53 = vld [vmem:[%s3942_s2 + $0x1d0] sm:$0xff] }
  0x35   : > { %1314 = vmatprep.subr.bf16.mxu0 %v3116_v55  ;;  %1202 = vmatpush1.bf16.msra.mxu1 %v3113_v61  ;;  %v482_v55 = vld [vmem:[%s3942_s2 + $0x1d8] sm:$0xff]  ;;  %v3085_v7 = vcombine.low %v473_v51, %v481_v53 }
  0x36   : > { %1203 = vmatprep.subr.bf16.mxu1 %v3130_v63  ;;  %v3088_v61 = vcombine.high %v474_v54, %v482_v55 }
  0x38   : > { %1315 = vmatpush1.bf16.msra.mxu0 %v3115_v62  ;;  %v489_v62 = vld [vmem:[%s3942_s2 + $0x210] sm:$0xff] }
  0x39   : > { %1316 = vmatprep.subr.bf16.mxu0 %v3132_v0  ;;  %1204 = vmatpush1.bf16.msra.mxu1 %v3129_v2  ;;  %v497_v0 = vld [vmem:[%s3942_s2 + $0x250] sm:$0xff]  ;;  %v498_v2 = vld [vmem:[%s3942_s2 + $0x258] sm:$0xff] }
  0x3a   : > { %1205 = vmatprep.subr.bf16.mxu1 %v3146_v6  ;;  %v3102_v11 = vcombine.high %v489_v62, %v497_v0 }
  0x3b   : > { %3191 = vmatmul.mubr.msk.bf16.gmra.mrb[12].mxu0 %vm277_vm0, %v3247_v60  ;;  %v3086_v60 = vcombine.high %v473_v51, %v481_v53  ;;  %v427_v53 = vld [vmem:[%s3942_s2 + $0x20] sm:$0xff] }
  0x3c   : > { %1317 = vmatpush1.bf16.msra.mxu0 %v3131_v1  ;;  %1336 = vmatprep.mubr.bf16.mxu0 %v3289_v14  ;;  %v490_v1 = vld [vmem:[%s3942_s2 + $0x218] sm:$0xff] }
  0x3d   : > { %1318 = vmatprep.subr.bf16.mxu0 %v3148_v9  ;;  %1206 = vmatpush1.bf16.msra.mxu1 %v3145_v10  ;;  %v3104_v12 = vcombine.high %v490_v1, %v498_v2 }
  0x3e   : > { %1417 = vmatprep.subr.bf16.mxu1 %v3038_v16  ;;  %v513_v16 = vld [vmem:[%s3942_s2 + $0x2d0] sm:$0xff] }
  0x40   : > { %1319 = vmatpush1.bf16.msra.mxu0 %v3147_v8  ;;  %v3087_v8 = vcombine.low %v474_v54, %v482_v55  ;;  %v435_v54 = vld [vmem:[%s3942_s2 + $0x60] sm:$0xff]  ;;  %v428_v55 = vld [vmem:[%s3942_s2 + $0x28] sm:$0xff] }
  0x41   : > { %1530 = vmatprep.subr.bf16.mxu0 %v3040_v19 }
  0xf6   : > { %v3180_v20 = vpop.f32.mrb[0].mxu0 }
  0xf7   : > { %v336_v21 = vpop.f32.mrb[1].mxu0  ;;  %v401_v23 = vmax.f32 %v3180_v20, 0.0 }
  0xf8   : > { %v3181_v22 = vpop.f32.mrb[2].mxu0  ;;  %v399_v27 = vmax.f32 %v336_v21, 0.0  ;;  %v3101_v21 = vcombine.low %v489_v62, %v497_v0  ;;  %v451_v0 = vld [vmem:[%s3942_s2 + $0xe0] sm:$0xff] }
  0xf9   : > { %v402_v24 = vmax.f32 %v3181_v22, 0.0  ;;  %v339_v25 = vpop.f32.mrb[3].mxu0  ;;  %v3103_v22 = vcombine.low %v490_v1, %v498_v2  ;;  %v444_v1 = vld [vmem:[%s3942_s2 + $0xa8] sm:$0xff] }
  0xfa   : > { %v400_v28 = vmax.f32 %v339_v25, 0.0  ;;  %v521_v25 = vld [vmem:[%s3942_s2 + $0x310] sm:$0xff]  ;;  %v452_v2 = vld [vmem:[%s3942_s2 + $0xe8] sm:$0xff] }
  0xfb   : > { %v3500_v32 = vpack.c.bf16 %v402_v24, %v401_v23  ;;  %v3118_v23 = vcombine.high %v505_v13, %v513_v16 }
  0xfc   : > { %v3502_v33 = vpack.c.bf16 %v400_v28, %v399_v27  ;;  %v529_v27 = vld [vmem:[%s3942_s2 + $0x350] sm:$0xff]  ;;  %v522_v28 = vld [vmem:[%s3942_s2 + $0x318] sm:$0xff] }
  0xfe   : > { %1224 = vmatmul.mubr.bf16.vlgmr.msra.gmra.mrb[0].mxu1 %v3502_v33  ;;  %1337 = vmatmul.mubr.bf16.vlgmr.msra.gmra.mrb[16].mxu0 %v3502_v33  ;;  %v3184_v40 = vpop.f32.mrb[4].mxu0 }
  0xff   : > { %1418 = vmatpush1.bf16.msra.mxu1 %v3037_v15  ;;  %1531 = vmatpush1.bf16.msra.mxu0 %v3039_v18  ;;  %v405_v41 = vmax.f32 %v3184_v40, 0.0  ;;  %v352_v42 = vpop.f32.mrb[5].mxu0  ;;  %v514_v18 = vld [vmem:[%s3942_s2 + $0x2d8] sm:$0xff]  ;;  %v3134_v40 = vcombine.high %v521_v25, %v529_v27 }
 0x100   : > { %v403_v45 = vmax.f32 %v352_v42, 0.0  ;;  %v3185_v46 = vpop.f32.mrb[6].mxu0  ;;  %1233 = vmatprep.mubr.bf16.mxu1 %v3289_v14  ;;  %1346 = vmatprep.mubr.bf16.mxu0 %v3289_v14  ;;  %v3120_v24 = vcombine.high %v506_v17, %v514_v18  ;;  %v3119_v37 = vcombine.low %v506_v17, %v514_v18  ;;  %v537_v42 = vld [vmem:[%s3942_s2 + $0x390] sm:$0xff]  ;;  %v483_v17 = vld [vmem:[%s3942_s2 + $0x1e0] sm:$0xff]  ;;  %v476_v18 = vld [vmem:[%s3942_s2 + $0x1a8] sm:$0xff] }
 0x101   : > { %v406_v49 = vmax.f32 %v3185_v46, 0.0  ;;  %1419 = vmatprep.subr.bf16.mxu1 %v3054_v35  ;;  %1532 = vmatprep.subr.bf16.mxu0 %v3056_v36  ;;  %v355_v50 = vpop.f32.mrb[7].mxu0  ;;  %v3117_v36 = vcombine.low %v505_v13, %v513_v16  ;;  %v546_v46 = vld [vmem:[%s3942_s2 + $0x3d8] sm:$0xff]  ;;  %v475_v16 = vld [vmem:[%s3942_s2 + $0x1a0] sm:$0xff] }
 0x102   : > { %v404_v52 = vmax.f32 %v355_v50, 0.0  ;;  %v3135_v50 = vcombine.low %v522_v28, %v530_v29 }
 0x103   : > { %v3532_v56 = vpack.c.bf16 %v406_v49, %v405_v41  ;;  %1420 = vmatpush1.bf16.msra.mxu1 %v3053_v43  ;;  %1533 = vmatpush1.bf16.msra.mxu0 %v3055_v44  ;;  %v3136_v41 = vcombine.high %v522_v28, %v530_v29  ;;  %v545_v44 = vld [vmem:[%s3942_s2 + $0x3d0] sm:$0xff]  ;;  %v3133_v49 = vcombine.low %v521_v25, %v529_v27  ;;  %v499_v27 = vld [vmem:[%s3942_s2 + $0x260] sm:$0xff]  ;;  %v492_v28 = vld [vmem:[%s3942_s2 + $0x228] sm:$0xff] }
 0x104   : > { %v3534_v57 = vpack.c.bf16 %v404_v52, %v403_v45  ;;  %1421 = vmatprep.subr.bf16.mxu1 %v3070_v47  ;;  %1534 = vmatprep.subr.bf16.mxu0 %v3072_v48  ;;  %v538_v45 = vld [vmem:[%s3942_s2 + $0x398] sm:$0xff]  ;;  %v3150_v51 = vcombine.high %v537_v42, %v545_v44  ;;  %v500_v29 = vld [vmem:[%s3942_s2 + $0x268] sm:$0xff] }
 0x105   : > { %v3152_v52 = vcombine.high %v538_v45, %v546_v46 }
 0x106   : > { %1234 = vmatmul.mubr.bf16.gmra.mrb[4].mxu1 %v3500_v32  ;;  %1347 = vmatmul.mubr.bf16.gmra.mrb[20].mxu0 %v3500_v32  ;;  %v3188_v63 = vpop.f32.mrb[8].mxu0 }
 0x107   : > { %1243 = vmatprep.mubr.bf16.mxu1 %v3289_v14  ;;  %1356 = vmatprep.mubr.bf16.mxu0 %v3289_v14  ;;  %v409_v3 = vmax.f32 %v3188_v63, 0.0  ;;  %v368_v4 = vpop.f32.mrb[9].mxu0  ;;  %v443_v63 = vld [vmem:[%s3942_s2 + $0xa0] sm:$0xff] }
 0x108   : > { %1422 = vmatpush1.bf16.msra.mxu1 %v3069_v58  ;;  %1535 = vmatpush1.bf16.msra.mxu0 %v3071_v59  ;;  %v407_v5 = vmax.f32 %v368_v4, 0.0  ;;  %v3189_v6 = vpop.f32.mrb[10].mxu0  ;;  %v436_v58 = vld [vmem:[%s3942_s2 + $0x68] sm:$0xff]  ;;  %v3149_v59 = vcombine.low %v537_v42, %v545_v44  ;;  %v523_v44 = vld [vmem:[%s3942_s2 + $0x320] sm:$0xff] }
 0x109   : > { %v410_v9 = vmax.f32 %v3189_v6, 0.0  ;;  %1423 = vmatprep.subr.bf16.mxu1 %v3086_v60  ;;  %1536 = vmatprep.subr.bf16.mxu0 %v3088_v61  ;;  %v371_v10 = vpop.f32.mrb[11].mxu0  ;;  %v3151_v60 = vcombine.low %v538_v45, %v546_v46  ;;  %v3042_v61 = vcombine.high %v427_v53, %v435_v54  ;;  %v3044_v62 = vcombine.high %v428_v55, %v436_v58  ;;  %v531_v45 = vld [vmem:[%s3942_s2 + $0x360] sm:$0xff]  ;;  %v524_v46 = vld [vmem:[%s3942_s2 + $0x328] sm:$0xff] }
 0x10a   : > { %v408_v15 = vmax.f32 %v371_v10, 0.0  ;;  %v3043_v4 = vcombine.low %v428_v55, %v436_v58  ;;  %v3058_v6 = vcombine.high %v443_v63, %v451_v0  ;;  %v468_v10 = vld [vmem:[%s3942_s2 + $0x168] sm:$0xff]  ;;  %v547_v55 = vld [vmem:[%s3942_s2 + $0x3e0] sm:$0xff] }
 0x10b   : > { %v3564_v19 = vpack.c.bf16 %v410_v9, %v409_v3  ;;  %v3041_v3 = vcombine.low %v427_v53, %v435_v54  ;;  %v460_v9 = vld [vmem:[%s3942_s2 + $0x128] sm:$0xff]  ;;  %v539_v54 = vld [vmem:[%s3942_s2 + $0x3a0] sm:$0xff] }
 0x10c   : > { %v3566_v20 = vpack.c.bf16 %v408_v15, %v407_v5  ;;  %1424 = vmatpush1.bf16.msra.mxu1 %v3085_v7  ;;  %1537 = vmatpush1.bf16.msra.mxu0 %v3087_v8  ;;  %v459_v5 = vld [vmem:[%s3942_s2 + $0x120] sm:$0xff]  ;;  %v3060_v7 = vcombine.high %v444_v1, %v452_v2  ;;  %v3076_v15 = vcombine.high %v460_v9, %v468_v10  ;;  %v540_v58 = vld [vmem:[%s3942_s2 + $0x3a8] sm:$0xff] }
 0x10d   : > { %1425 = vmatprep.subr.bf16.mxu1 %v3102_v11  ;;  %1538 = vmatprep.subr.bf16.mxu0 %v3104_v12  ;;  %v467_v8 = vld [vmem:[%s3942_s2 + $0x160] sm:$0xff]  ;;  %v3057_v11 = vcombine.low %v443_v63, %v451_v0  ;;  %v3059_v12 = vcombine.low %v444_v1, %v452_v2  ;;  %v429_v0 = vld [vmem:[%s3942_s2 + $0x30] sm:$0xff]  ;;  %v430_v2 = vld [vmem:[%s3942_s2 + $0x38] sm:$0xff] }
 0x10e   : > { %1244 = vmatmul.mubr.bf16.gmra.mrb[8].mxu1 %v3534_v57  ;;  %1357 = vmatmul.mubr.bf16.gmra.mrb[24].mxu0 %v3534_v57  ;;  %v3192_v26 = vpop.f32.mrb[12].mxu0  ;;  %v3074_v13 = vcombine.high %v459_v5, %v467_v8  ;;  %v437_v1 = vld [vmem:[%s3942_s2 + $0x70] sm:$0xff] }
 0x10f   : > { %1253 = vmatprep.mubr.bf16.mxu1 %v3289_v14  ;;  %1366 = vmatprep.mubr.bf16.mxu0 %v3289_v14  ;;  %v413_v30 = vmax.f32 %v3192_v26, 0.0  ;;  %v384_v31 = vpop.f32.mrb[13].mxu0  ;;  %v491_v26 = vld [vmem:[%s3942_s2 + $0x220] sm:$0xff] }
 0x110   : > { %1426 = vmatpush1.bf16.msra.mxu1 %v3101_v21  ;;  %1539 = vmatpush1.bf16.msra.mxu0 %v3103_v22  ;;  %v411_v34 = vmax.f32 %v384_v31, 0.0  ;;  %v3193_v35 = vpop.f32.mrb[14].mxu0  ;;  %v484_v21 = vld [vmem:[%s3942_s2 + $0x1e8] sm:$0xff]  ;;  %v3073_v22 = vcombine.low %v459_v5, %v467_v8  ;;  %v445_v8 = vld [vmem:[%s3942_s2 + $0xb0] sm:$0xff] }
 0x111   : > { %v414_v38 = vmax.f32 %v3193_v35, 0.0  ;;  %1427 = vmatprep.subr.bf16.mxu1 %v3118_v23  ;;  %1540 = vmatprep.subr.bf16.mxu0 %v3120_v24  ;;  %v387_v39 = vpop.f32.mrb[15].mxu0  ;;  %v3075_v23 = vcombine.low %v460_v9, %v468_v10  ;;  %v3090_v24 = vcombine.high %v475_v16, %v483_v17  ;;  %v3092_v25 = vcombine.high %v476_v18, %v484_v21  ;;  %v453_v9 = vld [vmem:[%s3942_s2 + $0xf0] sm:$0xff]  ;;  %v446_v10 = vld [vmem:[%s3942_s2 + $0xb8] sm:$0xff] }
 0x112   : > { %v412_v43 = vmax.f32 %v387_v39, 0.0  ;;  %v3091_v31 = vcombine.low %v476_v18, %v484_v21  ;;  %v3108_v35 = vcombine.high %v492_v28, %v500_v29  ;;  %v516_v39 = vld [vmem:[%s3942_s2 + $0x2e8] sm:$0xff]  ;;  %v469_v18 = vld [vmem:[%s3942_s2 + $0x170] sm:$0xff]  ;;  %v462_v21 = vld [vmem:[%s3942_s2 + $0x138] sm:$0xff] }
 0x113   : > { %v3596_v47 = vpack.c.bf16 %v414_v38, %v413_v30  ;;  %v3089_v30 = vcombine.low %v475_v16, %v483_v17  ;;  %v508_v38 = vld [vmem:[%s3942_s2 + $0x2a8] sm:$0xff]  ;;  %v3062_v16 = vcombine.high %v445_v8, %v453_v9 }
 0x114   : > { %v3598_v48 = vpack.c.bf16 %v412_v43, %v411_v34  ;;  %1428 = vmatpush1.bf16.msra.mxu1 %v3117_v36  ;;  %1541 = vmatpush1.bf16.msra.mxu0 %v3119_v37  ;;  %v3106_v34 = vcombine.high %v491_v26, %v499_v27  ;;  %v507_v36 = vld [vmem:[%s3942_s2 + $0x2a0] sm:$0xff]  ;;  %v3124_v43 = vcombine.high %v508_v38, %v516_v39 }
 0x115   : > { %1429 = vmatprep.subr.bf16.mxu1 %v3134_v40  ;;  %1542 = vmatprep.subr.bf16.mxu0 %v3136_v41  ;;  %v515_v37 = vld [vmem:[%s3942_s2 + $0x2e0] sm:$0xff]  ;;  %v3105_v40 = vcombine.low %v491_v26, %v499_v27  ;;  %v3107_v41 = vcombine.low %v492_v28, %v500_v29  ;;  %v477_v27 = vld [vmem:[%s3942_s2 + $0x1b0] sm:$0xff]  ;;  %v478_v29 = vld [vmem:[%s3942_s2 + $0x1b8] sm:$0xff] }
 0x116   : > { %1254 = vmatmul.mubr.bf16.gmra.mrb[12].mxu1 %v3532_v56  ;;  %1367 = vmatmul.mubr.bf16.gmra.mrb[28].mxu0 %v3532_v56  ;;  %v3122_v42 = vcombine.high %v507_v36, %v515_v37  ;;  %v485_v28 = vld [vmem:[%s3942_s2 + $0x1f0] sm:$0xff] }
 0x117   : > { %1263 = vmatprep.mubr.bf16.mxu1 %v3289_v14  ;;  %1376 = vmatprep.mubr.bf16.mxu0 %v3289_v14 }
 0x118   : > { %1430 = vmatpush1.bf16.msra.mxu1 %v3133_v49  ;;  %1543 = vmatpush1.bf16.msra.mxu0 %v3135_v50  ;;  %v532_v49 = vld [vmem:[%s3942_s2 + $0x368] sm:$0xff]  ;;  %v3121_v50 = vcombine.low %v507_v36, %v515_v37  ;;  %v493_v37 = vld [vmem:[%s3942_s2 + $0x230] sm:$0xff] }
 0x119   : > { %1431 = vmatprep.subr.bf16.mxu1 %v3150_v51  ;;  %1544 = vmatprep.subr.bf16.mxu0 %v3152_v52  ;;  %v3123_v51 = vcombine.low %v508_v38, %v516_v39  ;;  %v3138_v52 = vcombine.high %v523_v44, %v531_v45  ;;  %v3140_v53 = vcombine.high %v524_v46, %v532_v49  ;;  %v501_v38 = vld [vmem:[%s3942_s2 + $0x270] sm:$0xff]  ;;  %v494_v39 = vld [vmem:[%s3942_s2 + $0x238] sm:$0xff] }
 0x11c   : > { %1432 = vmatpush1.bf16.msra.mxu1 %v3149_v59  ;;  %1545 = vmatpush1.bf16.msra.mxu0 %v3151_v60  ;;  %v548_v59 = vld [vmem:[%s3942_s2 + $0x3e8] sm:$0xff]  ;;  %v3137_v60 = vcombine.low %v523_v44, %v531_v45  ;;  %v509_v45 = vld [vmem:[%s3942_s2 + $0x2b0] sm:$0xff] }
 0x11d   : > { %1643 = vmatprep.subr.bf16.mxu1 %v3042_v61  ;;  %1756 = vmatprep.subr.bf16.mxu0 %v3044_v62  ;;  %v3139_v61 = vcombine.low %v524_v46, %v532_v49  ;;  %v3154_v62 = vcombine.high %v539_v54, %v547_v55  ;;  %v3156_v63 = vcombine.high %v540_v58, %v548_v59  ;;  %v517_v46 = vld [vmem:[%s3942_s2 + $0x2f0] sm:$0xff]  ;;  %v510_v49 = vld [vmem:[%s3942_s2 + $0x2b8] sm:$0xff] }
 0x11e   : > { %1264 = vmatmul.mubr.bf16.gmra.mrb[16].mxu1 %v3566_v20  ;;  %1377 = vmatmul.mubr.bf16.gmra.mrb[32].mxu0 %v3566_v20  ;;  %v3155_v5 = vcombine.low %v540_v58, %v548_v59  ;;  %v533_v58 = vld [vmem:[%s3942_s2 + $0x370] sm:$0xff]  ;;  %v526_v59 = vld [vmem:[%s3942_s2 + $0x338] sm:$0xff] }
 0x11f   : > { %1273 = vmatprep.mubr.bf16.mxu1 %v3289_v14  ;;  %1386 = vmatprep.mubr.bf16.mxu0 %v3289_v14 }
 0x126   : > { %1274 = vmatmul.mubr.bf16.gmra.mrb[20].mxu1 %v3564_v19  ;;  %1387 = vmatmul.mubr.bf16.gmra.mrb[36].mxu0 %v3564_v19 }
 0x127   : > { %1283 = vmatprep.mubr.bf16.mxu1 %v3289_v14  ;;  %1396 = vmatprep.mubr.bf16.mxu0 %v3289_v14 }
 0x12e   : > { %1284 = vmatmul.mubr.bf16.gmra.mrb[24].mxu1 %v3598_v48  ;;  %1397 = vmatmul.mubr.bf16.gmra.mrb[40].mxu0 %v3598_v48 }
 0x12f   : > { %1293 = vmatprep.mubr.bf16.mxu1 %v3289_v14  ;;  %1406 = vmatprep.mubr.bf16.mxu0 %v3289_v14 }
 0x136   : > { %1294 = vmatmul.mubr.bf16.gmra.mrb[28].mxu1 %v3596_v47  ;;  %1407 = vmatmul.mubr.bf16.gmra.mrb[44].mxu0 %v3596_v47 }
 0x137   : > { %1449 = vmatprep.mubr.bf16.mxu1 %v3289_v14  ;;  %1562 = vmatprep.mubr.bf16.mxu0 %v3289_v14 }
 0x13e   : > { %1450 = vmatmul.mubr.bf16.vlgmr.msra.gmra.mrb[32].mxu1 %v3502_v33  ;;  %1563 = vmatmul.mubr.bf16.vlgmr.msra.gmra.mrb[48].mxu0 %v3502_v33 }
 0x13f   : > { %1644 = vmatpush1.bf16.msra.mxu1 %v3041_v3  ;;  %1757 = vmatpush1.bf16.msra.mxu0 %v3043_v4  ;;  %v438_v3 = vld [vmem:[%s3942_s2 + $0x78] sm:$0xff]  ;;  %v3153_v4 = vcombine.low %v539_v54, %v547_v55  ;;  %v525_v55 = vld [vmem:[%s3942_s2 + $0x330] sm:$0xff] }
 0x140   : > { %1459 = vmatprep.mubr.bf16.mxu1 %v3289_v14  ;;  %1572 = vmatprep.mubr.bf16.mxu0 %v3289_v14 }
 0x141   : > { %1645 = vmatprep.subr.bf16.mxu1 %v3058_v6  ;;  %1758 = vmatprep.subr.bf16.mxu0 %v3060_v7  ;;  %v3046_v6 = vcombine.high %v429_v0, %v437_v1  ;;  %v3048_v7 = vcombine.high %v430_v2, %v438_v3 }
 0x143   : > { %1646 = vmatpush1.bf16.msra.mxu1 %v3057_v11  ;;  %1759 = vmatpush1.bf16.msra.mxu0 %v3059_v12  ;;  %v454_v11 = vld [vmem:[%s3942_s2 + $0xf8] sm:$0xff]  ;;  %v3045_v12 = vcombine.low %v429_v0, %v437_v1  ;;  %v541_v1 = vld [vmem:[%s3942_s2 + $0x3b0] sm:$0xff] }
 0x144   : > { %1647 = vmatprep.subr.bf16.mxu1 %v3074_v13  ;;  %1760 = vmatprep.subr.bf16.mxu0 %v3076_v15  ;;  %v3047_v13 = vcombine.low %v430_v2, %v438_v3  ;;  %v461_v15 = vld [vmem:[%s3942_s2 + $0x130] sm:$0xff]  ;;  %v3064_v17 = vcombine.high %v446_v10, %v454_v11  ;;  %v542_v3 = vld [vmem:[%s3942_s2 + $0x3b8] sm:$0xff] }
 0x145   : > { %v549_v2 = vld [vmem:[%s3942_s2 + $0x3f0] sm:$0xff] }
 0x146   : > { %1460 = vmatmul.mubr.bf16.gmra.mrb[36].mxu1 %v3500_v32  ;;  %1573 = vmatmul.mubr.bf16.gmra.mrb[52].mxu0 %v3500_v32 }
 0x147   : > { %1469 = vmatprep.mubr.bf16.mxu1 %v3289_v14  ;;  %1582 = vmatprep.mubr.bf16.mxu0 %v3289_v14 }
 0x148   : > { %1648 = vmatpush1.bf16.msra.mxu1 %v3073_v22  ;;  %1761 = vmatpush1.bf16.msra.mxu0 %v3075_v23  ;;  %v470_v22 = vld [vmem:[%s3942_s2 + $0x178] sm:$0xff]  ;;  %v3061_v23 = vcombine.low %v445_v8, %v453_v9  ;;  %v3157_v9 = vcombine.low %v541_v1, %v549_v2 }
 0x149   : > { %1649 = vmatprep.subr.bf16.mxu1 %v3090_v24  ;;  %1762 = vmatprep.subr.bf16.mxu0 %v3092_v25  ;;  %v3063_v24 = vcombine.low %v446_v10, %v454_v11  ;;  %v3078_v25 = vcombine.high %v461_v15, %v469_v18  ;;  %v3080_v26 = vcombine.high %v462_v21, %v470_v22 }
 0x14c   : > { %1650 = vmatpush1.bf16.msra.mxu1 %v3089_v30  ;;  %1763 = vmatpush1.bf16.msra.mxu0 %v3091_v31  ;;  %v486_v30 = vld [vmem:[%s3942_s2 + $0x1f8] sm:$0xff]  ;;  %v3077_v31 = vcombine.low %v461_v15, %v469_v18 }
 0x14d   : > { %1651 = vmatprep.subr.bf16.mxu1 %v3106_v34  ;;  %1764 = vmatprep.subr.bf16.mxu0 %v3108_v35  ;;  %v3079_v34 = vcombine.low %v462_v21, %v470_v22  ;;  %v3094_v35 = vcombine.high %v477_v27, %v485_v28  ;;  %v3096_v36 = vcombine.high %v478_v29, %v486_v30 }
 0x14e   : > { %1470 = vmatmul.mubr.bf16.gmra.mrb[40].mxu1 %v3534_v57  ;;  %1583 = vmatmul.mubr.bf16.gmra.mrb[56].mxu0 %v3534_v57 }
 0x14f   : > { %1479 = vmatprep.mubr.bf16.mxu1 %v3289_v14  ;;  %1592 = vmatprep.mubr.bf16.mxu0 %v3289_v14 }
 0x150   : > { %1652 = vmatpush1.bf16.msra.mxu1 %v3105_v40  ;;  %1765 = vmatpush1.bf16.msra.mxu0 %v3107_v41  ;;  %v502_v40 = vld [vmem:[%s3942_s2 + $0x278] sm:$0xff]  ;;  %v3093_v41 = vcombine.low %v477_v27, %v485_v28 }
 0x151   : > { %1653 = vmatprep.subr.bf16.mxu1 %v3122_v42  ;;  %1766 = vmatprep.subr.bf16.mxu0 %v3124_v43  ;;  %v3095_v42 = vcombine.low %v478_v29, %v486_v30  ;;  %v3110_v43 = vcombine.high %v493_v37, %v501_v38  ;;  %v3112_v44 = vcombine.high %v494_v39, %v502_v40 }
 0x154   : > { %1654 = vmatpush1.bf16.msra.mxu1 %v3121_v50  ;;  %1767 = vmatpush1.bf16.msra.mxu0 %v3123_v51  ;;  %v518_v50 = vld [vmem:[%s3942_s2 + $0x2f8] sm:$0xff]  ;;  %v3109_v51 = vcombine.low %v493_v37, %v501_v38 }
 0x155   : > { %1655 = vmatprep.subr.bf16.mxu1 %v3138_v52  ;;  %1768 = vmatprep.subr.bf16.mxu0 %v3140_v53  ;;  %v3111_v52 = vcombine.low %v494_v39, %v502_v40  ;;  %v3126_v53 = vcombine.high %v509_v45, %v517_v46  ;;  %v3128_v54 = vcombine.high %v510_v49, %v518_v50 }
 0x156   : > { %1480 = vmatmul.mubr.bf16.gmra.mrb[44].mxu1 %v3532_v56  ;;  %1593 = vmatmul.mubr.bf16.gmra.mrb[60].mxu0 %v3532_v56 }
 0x157   : > { %1489 = vmatprep.mubr.bf16.mxu1 %v3289_v14  ;;  %1602 = vmatprep.mubr.bf16.mxu0 %v3289_v14 }
 0x158   : > { %1656 = vmatpush1.bf16.msra.mxu1 %v3137_v60  ;;  %1769 = vmatpush1.bf16.msra.mxu0 %v3139_v61  ;;  %v534_v60 = vld [vmem:[%s3942_s2 + $0x378] sm:$0xff]  ;;  %v3125_v61 = vcombine.low %v509_v45, %v517_v46 }
 0x159   : > { %1657 = vmatprep.subr.bf16.mxu1 %v3154_v62  ;;  %1770 = vmatprep.subr.bf16.mxu0 %v3156_v63  ;;  %v3127_v62 = vcombine.low %v510_v49, %v518_v50  ;;  %v3142_v63 = vcombine.high %v525_v55, %v533_v58  ;;  %v3144_v0 = vcombine.high %v526_v59, %v534_v60 }
 0x15c   : > { %1658 = vmatpush1.bf16.msra.mxu1 %v3153_v4  ;;  %1771 = vmatpush1.bf16.msra.mxu0 %v3155_v5  ;;  %v550_v4 = vld [vmem:[%s3942_s2 + $0x3f8] sm:$0xff]  ;;  %v3141_v5 = vcombine.low %v525_v55, %v533_v58 }
 0x15d   : > { %1869 = vmatprep.subr.bf16.mxu1 %v3046_v6  ;;  %1982 = vmatprep.subr.bf16.mxu0 %v3048_v7  ;;  %v3143_v6 = vcombine.low %v526_v59, %v534_v60  ;;  %v3158_v7 = vcombine.high %v541_v1, %v549_v2  ;;  %v3160_v8 = vcombine.high %v542_v3, %v550_v4 }
 0x15e   : > { %1490 = vmatmul.mubr.bf16.gmra.mrb[48].mxu1 %v3566_v20  ;;  %1603 = vmatmul.mubr.bf16.gmra.mrb[64].mxu0 %v3566_v20  ;;  %v3159_v10 = vcombine.low %v542_v3, %v550_v4 }
 0x15f   : > { %1499 = vmatprep.mubr.bf16.mxu1 %v3289_v14  ;;  %1612 = vmatprep.mubr.bf16.mxu0 %v3289_v14 }
 0x166   : > { %1500 = vmatmul.mubr.bf16.gmra.mrb[52].mxu1 %v3564_v19  ;;  %1613 = vmatmul.mubr.bf16.gmra.mrb[68].mxu0 %v3564_v19 }
 0x167   : > { %1509 = vmatprep.mubr.bf16.mxu1 %v3289_v14  ;;  %1622 = vmatprep.mubr.bf16.mxu0 %v3289_v14 }
 0x16e   : > { %1510 = vmatmul.mubr.bf16.gmra.mrb[56].mxu1 %v3598_v48  ;;  %1623 = vmatmul.mubr.bf16.gmra.mrb[72].mxu0 %v3598_v48 }
 0x16f   : > { %1519 = vmatprep.mubr.bf16.mxu1 %v3289_v14  ;;  %1632 = vmatprep.mubr.bf16.mxu0 %v3289_v14 }
 0x176   : > { %1520 = vmatmul.mubr.bf16.gmra.mrb[60].mxu1 %v3596_v47  ;;  %1633 = vmatmul.mubr.bf16.gmra.mrb[76].mxu0 %v3596_v47 }
 0x177   : > { %1675 = vmatprep.mubr.bf16.mxu1 %v3289_v14  ;;  %1788 = vmatprep.mubr.bf16.mxu0 %v3289_v14 }
 0x17e   : > { %1676 = vmatmul.mubr.bf16.vlgmr.msra.gmra.mrb[64].mxu1 %v3502_v33  ;;  %1789 = vmatmul.mubr.bf16.vlgmr.msra.gmra.mrb[80].mxu0 %v3502_v33 }
 0x17f   : > { %1870 = vmatpush1.bf16.msra.mxu1 %v3045_v12  ;;  %1983 = vmatpush1.bf16.msra.mxu0 %v3047_v13 }
 0x180   : > { %1685 = vmatprep.mubr.bf16.mxu1 %v3289_v14  ;;  %1798 = vmatprep.mubr.bf16.mxu0 %v3289_v14 }
 0x181   : > { %1871 = vmatprep.subr.bf16.mxu1 %v3062_v16  ;;  %1984 = vmatprep.subr.bf16.mxu0 %v3064_v17 }
 0x183   : > { %1872 = vmatpush1.bf16.msra.mxu1 %v3061_v23  ;;  %1985 = vmatpush1.bf16.msra.mxu0 %v3063_v24 }
 0x184   : > { %1873 = vmatprep.subr.bf16.mxu1 %v3078_v25  ;;  %1986 = vmatprep.subr.bf16.mxu0 %v3080_v26 }
 0x186   : > { %1686 = vmatmul.mubr.bf16.gmra.mrb[68].mxu1 %v3500_v32  ;;  %1799 = vmatmul.mubr.bf16.gmra.mrb[84].mxu0 %v3500_v32 }
 0x187   : > { %1695 = vmatprep.mubr.bf16.mxu1 %v3289_v14  ;;  %1808 = vmatprep.mubr.bf16.mxu0 %v3289_v14 }
 0x188   : > { %1874 = vmatpush1.bf16.msra.mxu1 %v3077_v31  ;;  %1987 = vmatpush1.bf16.msra.mxu0 %v3079_v34 }
 0x189   : > { %1875 = vmatprep.subr.bf16.mxu1 %v3094_v35  ;;  %1988 = vmatprep.subr.bf16.mxu0 %v3096_v36 }
 0x18c   : > { %1876 = vmatpush1.bf16.msra.mxu1 %v3093_v41  ;;  %1989 = vmatpush1.bf16.msra.mxu0 %v3095_v42 }
 0x18d   : > { %1877 = vmatprep.subr.bf16.mxu1 %v3110_v43  ;;  %1990 = vmatprep.subr.bf16.mxu0 %v3112_v44 }
 0x18e   : > { %1696 = vmatmul.mubr.bf16.gmra.mrb[72].mxu1 %v3534_v57  ;;  %1809 = vmatmul.mubr.bf16.gmra.mrb[88].mxu0 %v3534_v57 }
 0x18f   : > { %1705 = vmatprep.mubr.bf16.mxu1 %v3289_v14  ;;  %1818 = vmatprep.mubr.bf16.mxu0 %v3289_v14 }
 0x190   : > { %1878 = vmatpush1.bf16.msra.mxu1 %v3109_v51  ;;  %1991 = vmatpush1.bf16.msra.mxu0 %v3111_v52 }
 0x191   : > { %1879 = vmatprep.subr.bf16.mxu1 %v3126_v53  ;;  %1992 = vmatprep.subr.bf16.mxu0 %v3128_v54 }
 0x194   : > { %1880 = vmatpush1.bf16.msra.mxu1 %v3125_v61  ;;  %1993 = vmatpush1.bf16.msra.mxu0 %v3127_v62 }
 0x195   : > { %1881 = vmatprep.subr.bf16.mxu1 %v3142_v63  ;;  %1994 = vmatprep.subr.bf16.mxu0 %v3144_v0 }
 0x196   : > { %1706 = vmatmul.mubr.bf16.gmra.mrb[76].mxu1 %v3532_v56  ;;  %1819 = vmatmul.mubr.bf16.gmra.mrb[92].mxu0 %v3532_v56 }
 0x197   : > { %1715 = vmatprep.mubr.bf16.mxu1 %v3289_v14  ;;  %1828 = vmatprep.mubr.bf16.mxu0 %v3289_v14 }
 0x198   : > { %1882 = vmatpush1.bf16.msra.mxu1 %v3141_v5  ;;  %1995 = vmatpush1.bf16.msra.mxu0 %v3143_v6 }
 0x199   : > { %1883 = vmatprep.subr.bf16.mxu1 %v3158_v7  ;;  %1996 = vmatprep.subr.bf16.mxu0 %v3160_v8 }
 0x19c   : > { %1884 = vmatpush1.bf16.msra.mxu1 %v3157_v9  ;;  %1997 = vmatpush1.bf16.msra.mxu0 %v3159_v10 }
 0x19e   : > { %1716 = vmatmul.mubr.bf16.gmra.mrb[80].mxu1 %v3566_v20  ;;  %1829 = vmatmul.mubr.bf16.gmra.mrb[96].mxu0 %v3566_v20 }
 0x19f   : > { %1725 = vmatprep.mubr.bf16.mxu1 %v3289_v14  ;;  %1838 = vmatprep.mubr.bf16.mxu0 %v3289_v14 }
 0x1a6   : > { %1726 = vmatmul.mubr.bf16.gmra.mrb[84].mxu1 %v3564_v19  ;;  %1839 = vmatmul.mubr.bf16.gmra.mrb[100].mxu0 %v3564_v19 }
 0x1a7   : > { %1735 = vmatprep.mubr.bf16.mxu1 %v3289_v14  ;;  %1848 = vmatprep.mubr.bf16.mxu0 %v3289_v14 }
 0x1ae   : > { %1736 = vmatmul.mubr.bf16.gmra.mrb[88].mxu1 %v3598_v48  ;;  %1849 = vmatmul.mubr.bf16.gmra.mrb[104].mxu0 %v3598_v48 }
 0x1af   : > { %1745 = vmatprep.mubr.bf16.mxu1 %v3289_v14  ;;  %1858 = vmatprep.mubr.bf16.mxu0 %v3289_v14 }
 0x1b6   : > { %1746 = vmatmul.mubr.bf16.gmra.mrb[92].mxu1 %v3596_v47  ;;  %1859 = vmatmul.mubr.bf16.gmra.mrb[108].mxu0 %v3596_v47 }
 0x1b7   : > { %1901 = vmatprep.mubr.bf16.mxu1 %v3289_v14  ;;  %2014 = vmatprep.mubr.bf16.mxu0 %v3289_v14 }
 0x1be   : > { %1902 = vmatmul.mubr.bf16.vlgmr.msra.gmra.mrb[96].mxu1 %v3502_v33  ;;  %2015 = vmatmul.mubr.bf16.vlgmr.msra.gmra.mrb[112].mxu0 %v3502_v33 }
 0x1bf   : > { %1911 = vmatprep.mubr.bf16.mxu1 %v3289_v14  ;;  %2024 = vmatprep.mubr.bf16.mxu0 %v3289_v14 }
 0x1c6   : > { %1912 = vmatmul.mubr.bf16.gmra.mrb[100].mxu1 %v3500_v32  ;;  %2025 = vmatmul.mubr.bf16.gmra.mrb[116].mxu0 %v3500_v32 }
 0x1c7   : > { %1921 = vmatprep.mubr.bf16.mxu1 %v3289_v14  ;;  %2034 = vmatprep.mubr.bf16.mxu0 %v3289_v14 }
 0x1ce   : > { %1922 = vmatmul.mubr.bf16.gmra.mrb[104].mxu1 %v3534_v57  ;;  %2035 = vmatmul.mubr.bf16.gmra.mrb[120].mxu0 %v3534_v57 }
 0x1cf   : > { %1931 = vmatprep.mubr.bf16.mxu1 %v3289_v14  ;;  %2044 = vmatprep.mubr.bf16.mxu0 %v3289_v14 }
 0x1d1   : > { %v1225_v33 = vpop.f32.mrb[0].mxu1  ;;  %v1338_v11 = vpop.f32.mrb[16].mxu0 }
 0x1d2   : > { %v1227_v12 = vpop.f32.mrb[1].mxu1  ;;  %v1340_v13 = vpop.f32.mrb[17].mxu0  ;;  %v2095_v17 = vmax.f32 %v1225_v33, 0.0  ;;  %v2097_v32 = vmax.f32 %v1338_v11, 0.0 }
 0x1d3   : > { %v1229_v15 = vpop.f32.mrb[2].mxu1  ;;  %v1342_v16 = vpop.f32.mrb[18].mxu0  ;;  %v2096_v24 = vmax.f32 %v1227_v12, 0.0  ;;  %v2098_v25 = vmax.f32 %v1340_v13, 0.0 }
 0x1d4   : > { %v2111_v18 = vmax.f32 %v1229_v15, 0.0  ;;  %v2113_v21 = vmax.f32 %v1342_v16, 0.0  ;;  %v1231_v22 = vpop.f32.mrb[3].mxu1  ;;  %v1344_v23 = vpop.f32.mrb[19].mxu0 }
 0x1d5   : > { %v2112_v26 = vmax.f32 %v1231_v22, 0.0  ;;  %v2114_v57 = vmax.f32 %v1344_v23, 0.0 }
 0x1d6   : > { %v2351_v27 = vpack.c.bf16 %v2111_v18, %v2095_v17  ;;  %v2353_v28 = vpack.c.bf16 %v2113_v21, %v2097_v32  ;;  %1932 = vmatmul.mubr.bf16.gmra.mrb[108].mxu1 %v3532_v56  ;;  %2045 = vmatmul.mubr.bf16.gmra.mrb[124].mxu0 %v3532_v56 }
 0x1d7   : > { %v2352_v29 = vpack.c.bf16 %v2112_v26, %v2096_v24  ;;  %v2354_v30 = vpack.c.bf16 %v2114_v57, %v2098_v25  ;;  %1941 = vmatprep.mubr.bf16.mxu1 %v3289_v14  ;;  %2054 = vmatprep.mubr.bf16.mxu0 %v3289_v14 }
 0x1d9   : > { %v1235_v31 = vpop.f32.mrb[4].mxu1  ;;  %v1348_v34 = vpop.f32.mrb[20].mxu0  ;;  %2481 = vmatprep.subr.bf16.mxu1 %v2352_v29  ;;  %2522 = vmatprep.subr.bf16.mxu0 %v2354_v30 }
 0x1da   : > { %v1237_v35 = vpop.f32.mrb[5].mxu1  ;;  %v1350_v36 = vpop.f32.mrb[21].mxu0  ;;  %2482 = vmatpush1.bf16.msra.mxu1 %v2351_v27  ;;  %2523 = vmatpush1.bf16.msra.mxu0 %v2353_v28  ;;  %v2127_v39 = vmax.f32 %v1235_v31, 0.0  ;;  %v2129_v40 = vmax.f32 %v1348_v34, 0.0 }
 0x1db   : > { %v1239_v37 = vpop.f32.mrb[6].mxu1  ;;  %v1352_v38 = vpop.f32.mrb[22].mxu0  ;;  %v2128_v44 = vmax.f32 %v1237_v35, 0.0  ;;  %v2130_v45 = vmax.f32 %v1350_v36, 0.0 }
 0x1dc   : > { %v2143_v41 = vmax.f32 %v1239_v37, 0.0  ;;  %v2145_v56 = vmax.f32 %v1352_v38, 0.0  ;;  %v1241_v42 = vpop.f32.mrb[7].mxu1  ;;  %v1354_v43 = vpop.f32.mrb[23].mxu0 }
 0x1dd   : > { %v2144_v46 = vmax.f32 %v1241_v42, 0.0  ;;  %v2146_v49 = vmax.f32 %v1354_v43, 0.0 }
 0x1de   : > { %v2367_v50 = vpack.c.bf16 %v2143_v41, %v2127_v39  ;;  %v2369_v51 = vpack.c.bf16 %v2145_v56, %v2129_v40  ;;  %1942 = vmatmul.mubr.bf16.gmra.mrb[112].mxu1 %v3566_v20  ;;  %2055 = vmatmul.mubr.bf16.gmra.mrb[128].mxu0 %v3566_v20 }
 0x1df   : > { %v2368_v52 = vpack.c.bf16 %v2144_v46, %v2128_v44  ;;  %v2370_v53 = vpack.c.bf16 %v2146_v49, %v2130_v45  ;;  %1951 = vmatprep.mubr.bf16.mxu1 %v3289_v14  ;;  %2064 = vmatprep.mubr.bf16.mxu0 %v3289_v14 }
 0x1e1   : > { %v1245_v54 = vpop.f32.mrb[8].mxu1  ;;  %v1358_v55 = vpop.f32.mrb[24].mxu0  ;;  %2483 = vmatprep.subr.bf16.mxu1 %v2368_v52  ;;  %2524 = vmatprep.subr.bf16.mxu0 %v2370_v53 }
 0x1e2   : > { %v1247_v58 = vpop.f32.mrb[9].mxu1  ;;  %v1360_v59 = vpop.f32.mrb[25].mxu0  ;;  %2484 = vmatpush1.bf16.msra.mxu1 %v2367_v50  ;;  %2525 = vmatpush1.bf16.msra.mxu0 %v2369_v51  ;;  %v2159_v62 = vmax.f32 %v1245_v54, 0.0  ;;  %v2161_v63 = vmax.f32 %v1358_v55, 0.0 }
 0x1e3   : > { %v1249_v60 = vpop.f32.mrb[10].mxu1  ;;  %v1362_v61 = vpop.f32.mrb[26].mxu0  ;;  %v2160_v3 = vmax.f32 %v1247_v58, 0.0  ;;  %v2162_v4 = vmax.f32 %v1360_v59, 0.0 }
 0x1e4   : > { %v2175_v0 = vmax.f32 %v1249_v60, 0.0  ;;  %v2177_v20 = vmax.f32 %v1362_v61, 0.0  ;;  %v1251_v1 = vpop.f32.mrb[11].mxu1  ;;  %v1364_v2 = vpop.f32.mrb[27].mxu0 }
 0x1e5   : > { %v2176_v5 = vmax.f32 %v1251_v1, 0.0  ;;  %v2178_v6 = vmax.f32 %v1364_v2, 0.0 }
 0x1e6   : > { %v2383_v7 = vpack.c.bf16 %v2175_v0, %v2159_v62  ;;  %v2385_v8 = vpack.c.bf16 %v2177_v20, %v2161_v63  ;;  %1952 = vmatmul.mubr.bf16.gmra.mrb[116].mxu1 %v3564_v19  ;;  %2065 = vmatmul.mubr.bf16.gmra.mrb[132].mxu0 %v3564_v19 }
 0x1e7   : > { %v2384_v9 = vpack.c.bf16 %v2176_v5, %v2160_v3  ;;  %v2386_v10 = vpack.c.bf16 %v2178_v6, %v2162_v4  ;;  %1961 = vmatprep.mubr.bf16.mxu1 %v3289_v14  ;;  %2074 = vmatprep.mubr.bf16.mxu0 %v3289_v14 }
 0x1e9   : > { %v1255_v33 = vpop.f32.mrb[12].mxu1  ;;  %v1368_v11 = vpop.f32.mrb[28].mxu0  ;;  %2485 = vmatprep.subr.bf16.mxu1 %v2384_v9  ;;  %2526 = vmatprep.subr.bf16.mxu0 %v2386_v10 }
 0x1ea   : > { %v1257_v12 = vpop.f32.mrb[13].mxu1  ;;  %v1370_v13 = vpop.f32.mrb[29].mxu0  ;;  %2486 = vmatpush1.bf16.msra.mxu1 %v2383_v7  ;;  %2527 = vmatpush1.bf16.msra.mxu0 %v2385_v8  ;;  %v2191_v17 = vmax.f32 %v1255_v33, 0.0  ;;  %v2193_v32 = vmax.f32 %v1368_v11, 0.0 }
 0x1eb   : > { %v1259_v15 = vpop.f32.mrb[14].mxu1  ;;  %v1372_v16 = vpop.f32.mrb[30].mxu0  ;;  %v2192_v23 = vmax.f32 %v1257_v12, 0.0  ;;  %v2194_v24 = vmax.f32 %v1370_v13, 0.0 }
 0x1ec   : > { %v2207_v18 = vmax.f32 %v1259_v15, 0.0  ;;  %v2209_v19 = vmax.f32 %v1372_v16, 0.0  ;;  %v1261_v21 = vpop.f32.mrb[15].mxu1  ;;  %v1374_v22 = vpop.f32.mrb[31].mxu0 }
 0x1ed   : > { %v2208_v25 = vmax.f32 %v1261_v21, 0.0  ;;  %v2210_v26 = vmax.f32 %v1374_v22, 0.0 }
 0x1ee   : > { %v2399_v57 = vpack.c.bf16 %v2207_v18, %v2191_v17  ;;  %v2401_v27 = vpack.c.bf16 %v2209_v19, %v2193_v32  ;;  %1962 = vmatmul.mubr.bf16.gmra.mrb[120].mxu1 %v3598_v48  ;;  %2075 = vmatmul.mubr.bf16.gmra.mrb[136].mxu0 %v3598_v48 }
 0x1ef   : > { %v2400_v28 = vpack.c.bf16 %v2208_v25, %v2192_v23  ;;  %v2402_v29 = vpack.c.bf16 %v2210_v26, %v2194_v24  ;;  %1971 = vmatprep.mubr.bf16.mxu1 %v3289_v14  ;;  %2084 = vmatprep.mubr.bf16.mxu0 %v3289_v14 }
 0x1f1   : > { %v1265_v30 = vpop.f32.mrb[16].mxu1  ;;  %v1378_v31 = vpop.f32.mrb[32].mxu0  ;;  %2487 = vmatprep.subr.bf16.mxu1 %v2400_v28  ;;  %2528 = vmatprep.subr.bf16.mxu0 %v2402_v29 }
 0x1f2   : > { %v1267_v34 = vpop.f32.mrb[17].mxu1  ;;  %v1380_v35 = vpop.f32.mrb[33].mxu0  ;;  %2488 = vmatpush1.bf16.msra.mxu1 %v2399_v57  ;;  %2529 = vmatpush1.bf16.msra.mxu0 %v2401_v27  ;;  %v2223_v38 = vmax.f32 %v1265_v30, 0.0  ;;  %v2225_v39 = vmax.f32 %v1378_v31, 0.0 }
 0x1f3   : > { %v1269_v36 = vpop.f32.mrb[18].mxu1  ;;  %v1382_v37 = vpop.f32.mrb[34].mxu0  ;;  %v2224_v42 = vmax.f32 %v1267_v34, 0.0  ;;  %v2226_v43 = vmax.f32 %v1380_v35, 0.0 }
 0x1f4   : > { %v2239_v40 = vmax.f32 %v1269_v36, 0.0  ;;  %v2241_v48 = vmax.f32 %v1382_v37, 0.0  ;;  %v1271_v41 = vpop.f32.mrb[19].mxu1  ;;  %v1384_v56 = vpop.f32.mrb[35].mxu0 }
 0x1f5   : > { %v2240_v44 = vmax.f32 %v1271_v41, 0.0  ;;  %v2242_v45 = vmax.f32 %v1384_v56, 0.0 }
 0x1f6   : > { %v2415_v46 = vpack.c.bf16 %v2239_v40, %v2223_v38  ;;  %v2417_v49 = vpack.c.bf16 %v2241_v48, %v2225_v39  ;;  %1972 = vmatmul.mubr.bf16.gmra.mrb[124].mxu1 %v3596_v47  ;;  %2085 = vmatmul.mubr.bf16.gmra.mrb[140].mxu0 %v3596_v47 }
 0x1f7   : > { %v2416_v50 = vpack.c.bf16 %v2240_v44, %v2224_v42  ;;  %v2418_v51 = vpack.c.bf16 %v2242_v45, %v2226_v43  ;;  %2513 = vmatprep.mubr.bf16.mxu1 %v3289_v14  ;;  %2554 = vmatprep.mubr.bf16.mxu0 %v3289_v14 }
 0x1f9   : > { %v1275_v52 = vpop.f32.mrb[20].mxu1  ;;  %v1388_v53 = vpop.f32.mrb[36].mxu0  ;;  %2489 = vmatprep.subr.bf16.mxu1 %v2416_v50  ;;  %2530 = vmatprep.subr.bf16.mxu0 %v2418_v51 }
 0x1fa   : > { %v1277_v54 = vpop.f32.mrb[21].mxu1  ;;  %v1390_v55 = vpop.f32.mrb[37].mxu0  ;;  %2490 = vmatpush1.bf16.msra.mxu1 %v2415_v46  ;;  %2531 = vmatpush1.bf16.msra.mxu0 %v2417_v49  ;;  %v2255_v60 = vmax.f32 %v1275_v52, 0.0  ;;  %v2257_v61 = vmax.f32 %v1388_v53, 0.0 }
 0x1fb   : > { %v1279_v58 = vpop.f32.mrb[22].mxu1  ;;  %v1392_v59 = vpop.f32.mrb[38].mxu0  ;;  %v2256_v20 = vmax.f32 %v1277_v54, 0.0  ;;  %v2258_v1 = vmax.f32 %v1390_v55, 0.0 }
 0x1fc   : > { %v2271_v62 = vmax.f32 %v1279_v58, 0.0  ;;  %v2273_v47 = vmax.f32 %v1392_v59, 0.0  ;;  %v1281_v63 = vpop.f32.mrb[23].mxu1  ;;  %v1394_v0 = vpop.f32.mrb[39].mxu0 }
 0x1fd   : > { %v2272_v2 = vmax.f32 %v1281_v63, 0.0  ;;  %v2274_v3 = vmax.f32 %v1394_v0, 0.0 }
 0x1fe   : > { %v2431_v4 = vpack.c.bf16 %v2271_v62, %v2255_v60  ;;  %v2433_v5 = vpack.c.bf16 %v2273_v47, %v2257_v61 }
 0x1ff   : > { %v2432_v6 = vpack.c.bf16 %v2272_v2, %v2256_v20  ;;  %v2434_v7 = vpack.c.bf16 %v2274_v3, %v2258_v1  ;;  %v3290_v1 = vmov 1065369472  }
 0x201   : > { %v1285_v8 = vpop.f32.mrb[24].mxu1  ;;  %v1398_v9 = vpop.f32.mrb[40].mxu0  ;;  %2491 = vmatprep.subr.bf16.mxu1 %v2432_v6  ;;  %2532 = vmatprep.subr.bf16.mxu0 %v2434_v7 }
 0x202   : > { %v1287_v10 = vpop.f32.mrb[25].mxu1  ;;  %v1400_v33 = vpop.f32.mrb[41].mxu0  ;;  %2492 = vmatpush1.bf16.msra.mxu1 %v2431_v4  ;;  %2533 = vmatpush1.bf16.msra.mxu0 %v2433_v5  ;;  %v2287_v13 = vmax.f32 %v1285_v8, 0.0  ;;  %v2289_v15 = vmax.f32 %v1398_v9, 0.0 }
 0x203   : > { %v1289_v11 = vpop.f32.mrb[26].mxu1  ;;  %v1402_v12 = vpop.f32.mrb[42].mxu0  ;;  %v2288_v19 = vmax.f32 %v1287_v10, 0.0  ;;  %v2290_v21 = vmax.f32 %v1400_v33, 0.0 }
 0x204   : > { %v2303_v16 = vmax.f32 %v1289_v11, 0.0  ;;  %v2305_v17 = vmax.f32 %v1402_v12, 0.0  ;;  %v1291_v32 = vpop.f32.mrb[27].mxu1  ;;  %v1404_v18 = vpop.f32.mrb[43].mxu0 }
 0x205   : > { %v2304_v22 = vmax.f32 %v1291_v32, 0.0  ;;  %v2306_v23 = vmax.f32 %v1404_v18, 0.0 }
 0x206   : > { %v2447_v24 = vpack.c.bf16 %v2303_v16, %v2287_v13  ;;  %v2449_v25 = vpack.c.bf16 %v2305_v17, %v2289_v15 }
 0x207   : > { %v2448_v26 = vpack.c.bf16 %v2304_v22, %v2288_v19  ;;  %v2450_v57 = vpack.c.bf16 %v2306_v23, %v2290_v21 }
 0x209   : > { %v1295_v27 = vpop.f32.mrb[28].mxu1  ;;  %v1408_v28 = vpop.f32.mrb[44].mxu0  ;;  %2493 = vmatprep.subr.bf16.mxu1 %v2448_v26  ;;  %2534 = vmatprep.subr.bf16.mxu0 %v2450_v57 }
 0x20a   : > { %v1297_v29 = vpop.f32.mrb[29].mxu1  ;;  %v1410_v30 = vpop.f32.mrb[45].mxu0  ;;  %2494 = vmatpush1.bf16.msra.mxu1 %v2447_v24  ;;  %2535 = vmatpush1.bf16.msra.mxu0 %v2449_v25  ;;  %v2319_v35 = vmax.f32 %v1295_v27, 0.0  ;;  %v2321_v36 = vmax.f32 %v1408_v28, 0.0 }
 0x20b   : > { %v1299_v31 = vpop.f32.mrb[30].mxu1  ;;  %v1412_v34 = vpop.f32.mrb[46].mxu0  ;;  %v2320_v48 = vmax.f32 %v1297_v29, 0.0  ;;  %v2322_v41 = vmax.f32 %v1410_v30, 0.0 }
 0x20c   : > { %v2335_v37 = vmax.f32 %v1299_v31, 0.0  ;;  %v2337_v38 = vmax.f32 %v1412_v34, 0.0  ;;  %v1301_v39 = vpop.f32.mrb[31].mxu1  ;;  %v1414_v40 = vpop.f32.mrb[47].mxu0 }
 0x20d   : > { %v2336_v56 = vmax.f32 %v1301_v39, 0.0  ;;  %v2338_v42 = vmax.f32 %v1414_v40, 0.0 }
 0x20e   : > { %v2463_v43 = vpack.c.bf16 %v2335_v37, %v2319_v35  ;;  %v2465_v44 = vpack.c.bf16 %v2337_v38, %v2321_v36 }
 0x20f   : > { %v2464_v45 = vpack.c.bf16 %v2336_v56, %v2320_v48  ;;  %v2466_v46 = vpack.c.bf16 %v2338_v42, %v2322_v41 }
 0x211   : > { %v1451_v49 = vpop.f32.mrb[32].mxu1  ;;  %v1564_v50 = vpop.f32.mrb[48].mxu0  ;;  %2495 = vmatprep.subr.bf16.mxu1 %v2464_v45  ;;  %2536 = vmatprep.subr.bf16.mxu0 %v2466_v46 }
 0x212   : > { %v1453_v51 = vpop.f32.mrb[33].mxu1  ;;  %v1566_v52 = vpop.f32.mrb[49].mxu0  ;;  %2496 = vmatpush1.bf16.msra.mxu1 %v2463_v43  ;;  %2537 = vmatpush1.bf16.msra.mxu0 %v2465_v44  ;;  %v2099_v55 = vmax.f32 %v1451_v49, 0.0  ;;  %v2101_v58 = vmax.f32 %v1564_v50, 0.0 }
 0x213   : > { %v1455_v53 = vpop.f32.mrb[34].mxu1  ;;  %v1568_v54 = vpop.f32.mrb[50].mxu0  ;;  %v2100_v47 = vmax.f32 %v1453_v51, 0.0  ;;  %v2102_v63 = vmax.f32 %v1566_v52, 0.0 }
 0x214   : > { %v2115_v59 = vmax.f32 %v1455_v53, 0.0  ;;  %v2117_v60 = vmax.f32 %v1568_v54, 0.0  ;;  %v1457_v61 = vpop.f32.mrb[35].mxu1  ;;  %v1570_v62 = vpop.f32.mrb[51].mxu0 }
 0x215   : > { %v2116_v0 = vmax.f32 %v1457_v61, 0.0  ;;  %v2118_v20 = vmax.f32 %v1570_v62, 0.0  ;;  %2514 = vmatmul.mubr.bf16.vlgmr.msra.gmra.mrb[128].mxu1 %v3290_v1  ;;  %2555 = vmatmul.mubr.bf16.vlgmr.msra.gmra.mrb[144].mxu0 %v3290_v1 }
 0x216   : > { %v2355_v2 = vpack.c.bf16 %v2115_v59, %v2099_v55  ;;  %v2357_v3 = vpack.c.bf16 %v2117_v60, %v2101_v58  ;;  %2595 = vmatprep.mubr.bf16.mxu1 %v3289_v14  ;;  %2636 = vmatprep.mubr.bf16.mxu0 %v3289_v14 }
 0x217   : > { %v2356_v4 = vpack.c.bf16 %v2116_v0, %v2100_v47  ;;  %v2358_v5 = vpack.c.bf16 %v2118_v20, %v2102_v63 }
 0x219   : > { %v1461_v6 = vpop.f32.mrb[36].mxu1  ;;  %v1574_v7 = vpop.f32.mrb[52].mxu0  ;;  %2563 = vmatprep.subr.bf16.mxu1 %v2356_v4  ;;  %2604 = vmatprep.subr.bf16.mxu0 %v2358_v5 }
 0x21a   : > { %v1463_v8 = vpop.f32.mrb[37].mxu1  ;;  %v1576_v9 = vpop.f32.mrb[53].mxu0  ;;  %2564 = vmatpush1.bf16.msra.mxu1 %v2355_v2  ;;  %2605 = vmatpush1.bf16.msra.mxu0 %v2357_v3  ;;  %v2131_v11 = vmax.f32 %v1461_v6, 0.0  ;;  %v2133_v12 = vmax.f32 %v1574_v7, 0.0 }
 0x21b   : > { %v1465_v10 = vpop.f32.mrb[38].mxu1  ;;  %v1578_v33 = vpop.f32.mrb[54].mxu0  ;;  %v2132_v32 = vmax.f32 %v1463_v8, 0.0  ;;  %v2134_v18 = vmax.f32 %v1576_v9, 0.0 }
 0x21c   : > { %v2147_v13 = vmax.f32 %v1465_v10, 0.0  ;;  %v2149_v15 = vmax.f32 %v1578_v33, 0.0  ;;  %v1467_v16 = vpop.f32.mrb[39].mxu1  ;;  %v1580_v17 = vpop.f32.mrb[55].mxu0 }
 0x21d   : > { %v2148_v19 = vmax.f32 %v1467_v16, 0.0  ;;  %v2150_v21 = vmax.f32 %v1580_v17, 0.0 }
 0x21e   : > { %v2371_v22 = vpack.c.bf16 %v2147_v13, %v2131_v11  ;;  %v2373_v23 = vpack.c.bf16 %v2149_v15, %v2133_v12 }
 0x21f   : > { %v2372_v24 = vpack.c.bf16 %v2148_v19, %v2132_v32  ;;  %v2374_v25 = vpack.c.bf16 %v2150_v21, %v2134_v18 }
 0x221   : > { %v1471_v26 = vpop.f32.mrb[40].mxu1  ;;  %v1584_v57 = vpop.f32.mrb[56].mxu0  ;;  %2565 = vmatprep.subr.bf16.mxu1 %v2372_v24  ;;  %2606 = vmatprep.subr.bf16.mxu0 %v2374_v25 }
 0x222   : > { %v1473_v27 = vpop.f32.mrb[41].mxu1  ;;  %v1586_v28 = vpop.f32.mrb[57].mxu0  ;;  %2566 = vmatpush1.bf16.msra.mxu1 %v2371_v22  ;;  %2607 = vmatpush1.bf16.msra.mxu0 %v2373_v23  ;;  %v2163_v31 = vmax.f32 %v1471_v26, 0.0  ;;  %v2165_v34 = vmax.f32 %v1584_v57, 0.0 }
 0x223   : > { %v1475_v29 = vpop.f32.mrb[42].mxu1  ;;  %v1588_v30 = vpop.f32.mrb[58].mxu0  ;;  %v2164_v39 = vmax.f32 %v1473_v27, 0.0  ;;  %v2166_v40 = vmax.f32 %v1586_v28, 0.0 }
 0x224   : > { %v2179_v35 = vmax.f32 %v1475_v29, 0.0  ;;  %v2181_v36 = vmax.f32 %v1588_v30, 0.0  ;;  %v1477_v37 = vpop.f32.mrb[43].mxu1  ;;  %v1590_v38 = vpop.f32.mrb[59].mxu0 }
 0x225   : > { %v2180_v48 = vmax.f32 %v1477_v37, 0.0  ;;  %v2182_v41 = vmax.f32 %v1590_v38, 0.0 }
 0x226   : > { %v2387_v56 = vpack.c.bf16 %v2179_v35, %v2163_v31  ;;  %v2389_v42 = vpack.c.bf16 %v2181_v36, %v2165_v34 }
 0x227   : > { %v2388_v43 = vpack.c.bf16 %v2180_v48, %v2164_v39  ;;  %v2390_v44 = vpack.c.bf16 %v2182_v41, %v2166_v40 }
 0x229   : > { %v1481_v45 = vpop.f32.mrb[44].mxu1  ;;  %v1594_v46 = vpop.f32.mrb[60].mxu0  ;;  %2567 = vmatprep.subr.bf16.mxu1 %v2388_v43  ;;  %2608 = vmatprep.subr.bf16.mxu0 %v2390_v44 }
 0x22a   : > { %v1483_v49 = vpop.f32.mrb[45].mxu1  ;;  %v1596_v50 = vpop.f32.mrb[61].mxu0  ;;  %2568 = vmatpush1.bf16.msra.mxu1 %v2387_v56  ;;  %2609 = vmatpush1.bf16.msra.mxu0 %v2389_v42  ;;  %v2195_v53 = vmax.f32 %v1481_v45, 0.0  ;;  %v2197_v54 = vmax.f32 %v1594_v46, 0.0 }
 0x22b   : > { %v1485_v51 = vpop.f32.mrb[46].mxu1  ;;  %v1598_v52 = vpop.f32.mrb[62].mxu0  ;;  %v2196_v61 = vmax.f32 %v1483_v49, 0.0  ;;  %v2198_v62 = vmax.f32 %v1596_v50, 0.0 }
 0x22c   : > { %v2211_v55 = vmax.f32 %v1485_v51, 0.0  ;;  %v2213_v58 = vmax.f32 %v1598_v52, 0.0  ;;  %v1487_v59 = vpop.f32.mrb[47].mxu1  ;;  %v1600_v60 = vpop.f32.mrb[63].mxu0 }
 0x22d   : > { %v2212_v47 = vmax.f32 %v1487_v59, 0.0  ;;  %v2214_v63 = vmax.f32 %v1600_v60, 0.0 }
 0x22e   : > { %v2403_v0 = vpack.c.bf16 %v2211_v55, %v2195_v53  ;;  %v2405_v20 = vpack.c.bf16 %v2213_v58, %v2197_v54 }
 0x22f   : > { %v2404_v2 = vpack.c.bf16 %v2212_v47, %v2196_v61  ;;  %v2406_v3 = vpack.c.bf16 %v2214_v63, %v2198_v62 }
 0x231   : > { %v1491_v4 = vpop.f32.mrb[48].mxu1  ;;  %v1604_v5 = vpop.f32.mrb[64].mxu0  ;;  %2569 = vmatprep.subr.bf16.mxu1 %v2404_v2  ;;  %2610 = vmatprep.subr.bf16.mxu0 %v2406_v3 }
 0x232   : > { %v1493_v6 = vpop.f32.mrb[49].mxu1  ;;  %v1606_v7 = vpop.f32.mrb[65].mxu0  ;;  %2570 = vmatpush1.bf16.msra.mxu1 %v2403_v0  ;;  %2611 = vmatpush1.bf16.msra.mxu0 %v2405_v20  ;;  %v2227_v10 = vmax.f32 %v1491_v4, 0.0  ;;  %v2229_v33 = vmax.f32 %v1604_v5, 0.0 }
 0x233   : > { %v1495_v8 = vpop.f32.mrb[50].mxu1  ;;  %v1608_v9 = vpop.f32.mrb[66].mxu0  ;;  %v2228_v16 = vmax.f32 %v1493_v6, 0.0  ;;  %v2230_v17 = vmax.f32 %v1606_v7, 0.0 }
 0x234   : > { %v2243_v11 = vmax.f32 %v1495_v8, 0.0  ;;  %v2245_v12 = vmax.f32 %v1608_v9, 0.0  ;;  %v1497_v13 = vpop.f32.mrb[51].mxu1  ;;  %v1610_v15 = vpop.f32.mrb[67].mxu0 }
 0x235   : > { %v2244_v32 = vmax.f32 %v1497_v13, 0.0  ;;  %v2246_v18 = vmax.f32 %v1610_v15, 0.0 }
 0x236   : > { %v2419_v19 = vpack.c.bf16 %v2243_v11, %v2227_v10  ;;  %v2421_v21 = vpack.c.bf16 %v2245_v12, %v2229_v33 }
 0x237   : > { %v2420_v22 = vpack.c.bf16 %v2244_v32, %v2228_v16  ;;  %v2422_v23 = vpack.c.bf16 %v2246_v18, %v2230_v17 }
 0x239   : > { %v1501_v24 = vpop.f32.mrb[52].mxu1  ;;  %v1614_v25 = vpop.f32.mrb[68].mxu0  ;;  %2571 = vmatprep.subr.bf16.mxu1 %v2420_v22  ;;  %2612 = vmatprep.subr.bf16.mxu0 %v2422_v23 }
 0x23a   : > { %v1503_v26 = vpop.f32.mrb[53].mxu1  ;;  %v1616_v57 = vpop.f32.mrb[69].mxu0  ;;  %2572 = vmatpush1.bf16.msra.mxu1 %v2419_v19  ;;  %2613 = vmatpush1.bf16.msra.mxu0 %v2421_v21  ;;  %v2259_v29 = vmax.f32 %v1501_v24, 0.0  ;;  %v2261_v30 = vmax.f32 %v1614_v25, 0.0 }
 0x23b   : > { %v1505_v27 = vpop.f32.mrb[54].mxu1  ;;  %v1618_v28 = vpop.f32.mrb[70].mxu0  ;;  %v2260_v37 = vmax.f32 %v1503_v26, 0.0  ;;  %v2262_v38 = vmax.f32 %v1616_v57, 0.0 }
 0x23c   : > { %v2275_v31 = vmax.f32 %v1505_v27, 0.0  ;;  %v2277_v34 = vmax.f32 %v1618_v28, 0.0  ;;  %v1507_v35 = vpop.f32.mrb[55].mxu1  ;;  %v1620_v36 = vpop.f32.mrb[71].mxu0 }
 0x23d   : > { %v2276_v39 = vmax.f32 %v1507_v35, 0.0  ;;  %v2278_v40 = vmax.f32 %v1620_v36, 0.0 }
 0x23e   : > { %v2435_v48 = vpack.c.bf16 %v2275_v31, %v2259_v29  ;;  %v2437_v41 = vpack.c.bf16 %v2277_v34, %v2261_v30 }
 0x23f   : > { %v2436_v56 = vpack.c.bf16 %v2276_v39, %v2260_v37  ;;  %v2438_v42 = vpack.c.bf16 %v2278_v40, %v2262_v38 }
 0x241   : > { %v1511_v43 = vpop.f32.mrb[56].mxu1  ;;  %v1624_v44 = vpop.f32.mrb[72].mxu0  ;;  %2573 = vmatprep.subr.bf16.mxu1 %v2436_v56  ;;  %2614 = vmatprep.subr.bf16.mxu0 %v2438_v42 }
 0x242   : > { %v1513_v45 = vpop.f32.mrb[57].mxu1  ;;  %v1626_v46 = vpop.f32.mrb[73].mxu0  ;;  %2574 = vmatpush1.bf16.msra.mxu1 %v2435_v48  ;;  %2615 = vmatpush1.bf16.msra.mxu0 %v2437_v41  ;;  %v2291_v51 = vmax.f32 %v1511_v43, 0.0  ;;  %v2293_v52 = vmax.f32 %v1624_v44, 0.0 }
 0x243   : > { %v1515_v49 = vpop.f32.mrb[58].mxu1  ;;  %v1628_v50 = vpop.f32.mrb[74].mxu0  ;;  %v2292_v59 = vmax.f32 %v1513_v45, 0.0  ;;  %v2294_v60 = vmax.f32 %v1626_v46, 0.0 }
 0x244   : > { %v2307_v53 = vmax.f32 %v1515_v49, 0.0  ;;  %v2309_v54 = vmax.f32 %v1628_v50, 0.0  ;;  %v1517_v55 = vpop.f32.mrb[59].mxu1  ;;  %v1630_v58 = vpop.f32.mrb[75].mxu0 }
 0x245   : > { %v2308_v61 = vmax.f32 %v1517_v55, 0.0  ;;  %v2310_v62 = vmax.f32 %v1630_v58, 0.0 }
 0x246   : > { %v2451_v47 = vpack.c.bf16 %v2307_v53, %v2291_v51  ;;  %v2453_v63 = vpack.c.bf16 %v2309_v54, %v2293_v52 }
 0x247   : > { %v2452_v0 = vpack.c.bf16 %v2308_v61, %v2292_v59  ;;  %v2454_v20 = vpack.c.bf16 %v2310_v62, %v2294_v60 }
 0x249   : > { %v1521_v2 = vpop.f32.mrb[60].mxu1  ;;  %v1634_v3 = vpop.f32.mrb[76].mxu0  ;;  %2575 = vmatprep.subr.bf16.mxu1 %v2452_v0  ;;  %2616 = vmatprep.subr.bf16.mxu0 %v2454_v20 }
 0x24a   : > { %v1523_v4 = vpop.f32.mrb[61].mxu1  ;;  %v1636_v5 = vpop.f32.mrb[77].mxu0  ;;  %2576 = vmatpush1.bf16.msra.mxu1 %v2451_v47  ;;  %2617 = vmatpush1.bf16.msra.mxu0 %v2453_v63  ;;  %v2323_v8 = vmax.f32 %v1521_v2, 0.0  ;;  %v2325_v9 = vmax.f32 %v1634_v3, 0.0 }
 0x24b   : > { %v1525_v6 = vpop.f32.mrb[62].mxu1  ;;  %v1638_v7 = vpop.f32.mrb[78].mxu0  ;;  %v2324_v13 = vmax.f32 %v1523_v4, 0.0  ;;  %v2326_v15 = vmax.f32 %v1636_v5, 0.0 }
 0x24c   : > { %v2339_v10 = vmax.f32 %v1525_v6, 0.0  ;;  %v2341_v33 = vmax.f32 %v1638_v7, 0.0  ;;  %v1527_v11 = vpop.f32.mrb[63].mxu1  ;;  %v1640_v12 = vpop.f32.mrb[79].mxu0 }
 0x24d   : > { %v2340_v16 = vmax.f32 %v1527_v11, 0.0  ;;  %v2342_v17 = vmax.f32 %v1640_v12, 0.0 }
 0x24e   : > { %v2467_v32 = vpack.c.bf16 %v2339_v10, %v2323_v8  ;;  %v2469_v18 = vpack.c.bf16 %v2341_v33, %v2325_v9 }
 0x24f   : > { %v2468_v19 = vpack.c.bf16 %v2340_v16, %v2324_v13  ;;  %v2470_v21 = vpack.c.bf16 %v2342_v17, %v2326_v15 }
 0x251   : > { %v1677_v22 = vpop.f32.mrb[64].mxu1  ;;  %v1790_v23 = vpop.f32.mrb[80].mxu0  ;;  %2577 = vmatprep.subr.bf16.mxu1 %v2468_v19  ;;  %2618 = vmatprep.subr.bf16.mxu0 %v2470_v21 }
 0x252   : > { %v1679_v24 = vpop.f32.mrb[65].mxu1  ;;  %v1792_v25 = vpop.f32.mrb[81].mxu0  ;;  %2578 = vmatpush1.bf16.msra.mxu1 %v2467_v32  ;;  %2619 = vmatpush1.bf16.msra.mxu0 %v2469_v18  ;;  %v2103_v27 = vmax.f32 %v1677_v22, 0.0  ;;  %v2105_v28 = vmax.f32 %v1790_v23, 0.0 }
 0x253   : > { %v1681_v26 = vpop.f32.mrb[66].mxu1  ;;  %v1794_v57 = vpop.f32.mrb[82].mxu0  ;;  %v2104_v35 = vmax.f32 %v1679_v24, 0.0  ;;  %v2106_v36 = vmax.f32 %v1792_v25, 0.0 }
 0x254   : > { %v2119_v29 = vmax.f32 %v1681_v26, 0.0  ;;  %v2121_v30 = vmax.f32 %v1794_v57, 0.0  ;;  %v1683_v31 = vpop.f32.mrb[67].mxu1  ;;  %v1796_v34 = vpop.f32.mrb[83].mxu0 }
 0x255   : > { %v2120_v37 = vmax.f32 %v1683_v31, 0.0  ;;  %v2122_v38 = vmax.f32 %v1796_v34, 0.0  ;;  %2596 = vmatmul.mubr.bf16.vlgmr.msra.gmra.mrb[132].mxu1 %v3290_v1  ;;  %2637 = vmatmul.mubr.bf16.vlgmr.msra.gmra.mrb[148].mxu0 %v3290_v1 }
 0x256   : > { %v2359_v39 = vpack.c.bf16 %v2119_v29, %v2103_v27  ;;  %v2361_v40 = vpack.c.bf16 %v2121_v30, %v2105_v28  ;;  %2677 = vmatprep.mubr.bf16.mxu1 %v3289_v14  ;;  %2718 = vmatprep.mubr.bf16.mxu0 %v3289_v14 }
 0x257   : > { %v2360_v48 = vpack.c.bf16 %v2120_v37, %v2104_v35  ;;  %v2362_v41 = vpack.c.bf16 %v2122_v38, %v2106_v36 }
 0x259   : > { %v1687_v56 = vpop.f32.mrb[68].mxu1  ;;  %v1800_v42 = vpop.f32.mrb[84].mxu0  ;;  %2645 = vmatprep.subr.bf16.mxu1 %v2360_v48  ;;  %2686 = vmatprep.subr.bf16.mxu0 %v2362_v41 }
 0x25a   : > { %v1689_v43 = vpop.f32.mrb[69].mxu1  ;;  %v1802_v44 = vpop.f32.mrb[85].mxu0  ;;  %2646 = vmatpush1.bf16.msra.mxu1 %v2359_v39  ;;  %2687 = vmatpush1.bf16.msra.mxu0 %v2361_v40  ;;  %v2135_v49 = vmax.f32 %v1687_v56, 0.0  ;;  %v2137_v50 = vmax.f32 %v1800_v42, 0.0 }
 0x25b   : > { %v1691_v45 = vpop.f32.mrb[70].mxu1  ;;  %v1804_v46 = vpop.f32.mrb[86].mxu0  ;;  %v2136_v55 = vmax.f32 %v1689_v43, 0.0  ;;  %v2138_v58 = vmax.f32 %v1802_v44, 0.0 }
 0x25c   : > { %v2151_v51 = vmax.f32 %v1691_v45, 0.0  ;;  %v2153_v52 = vmax.f32 %v1804_v46, 0.0  ;;  %v1693_v53 = vpop.f32.mrb[71].mxu1  ;;  %v1806_v54 = vpop.f32.mrb[87].mxu0 }
 0x25d   : > { %v2152_v59 = vmax.f32 %v1693_v53, 0.0  ;;  %v2154_v60 = vmax.f32 %v1806_v54, 0.0 }
 0x25e   : > { %v2375_v61 = vpack.c.bf16 %v2151_v51, %v2135_v49  ;;  %v2377_v62 = vpack.c.bf16 %v2153_v52, %v2137_v50 }
 0x25f   : > { %v2376_v47 = vpack.c.bf16 %v2152_v59, %v2136_v55  ;;  %v2378_v63 = vpack.c.bf16 %v2154_v60, %v2138_v58 }
 0x261   : > { %v1697_v0 = vpop.f32.mrb[72].mxu1  ;;  %v1810_v20 = vpop.f32.mrb[88].mxu0  ;;  %2647 = vmatprep.subr.bf16.mxu1 %v2376_v47  ;;  %2688 = vmatprep.subr.bf16.mxu0 %v2378_v63 }
 0x262   : > { %v1699_v2 = vpop.f32.mrb[73].mxu1  ;;  %v1812_v3 = vpop.f32.mrb[89].mxu0  ;;  %2648 = vmatpush1.bf16.msra.mxu1 %v2375_v61  ;;  %2689 = vmatpush1.bf16.msra.mxu0 %v2377_v62  ;;  %v2167_v6 = vmax.f32 %v1697_v0, 0.0  ;;  %v2169_v7 = vmax.f32 %v1810_v20, 0.0 }
 0x263   : > { %v1701_v4 = vpop.f32.mrb[74].mxu1  ;;  %v1814_v5 = vpop.f32.mrb[90].mxu0  ;;  %v2168_v11 = vmax.f32 %v1699_v2, 0.0  ;;  %v2170_v12 = vmax.f32 %v1812_v3, 0.0 }
 0x264   : > { %v2183_v8 = vmax.f32 %v1701_v4, 0.0  ;;  %v2185_v9 = vmax.f32 %v1814_v5, 0.0  ;;  %v1703_v10 = vpop.f32.mrb[75].mxu1  ;;  %v1816_v33 = vpop.f32.mrb[91].mxu0 }
 0x265   : > { %v2184_v13 = vmax.f32 %v1703_v10, 0.0  ;;  %v2186_v15 = vmax.f32 %v1816_v33, 0.0 }
 0x266   : > { %v2391_v16 = vpack.c.bf16 %v2183_v8, %v2167_v6  ;;  %v2393_v17 = vpack.c.bf16 %v2185_v9, %v2169_v7 }
 0x267   : > { %v2392_v32 = vpack.c.bf16 %v2184_v13, %v2168_v11  ;;  %v2394_v18 = vpack.c.bf16 %v2186_v15, %v2170_v12 }
 0x269   : > { %v1707_v19 = vpop.f32.mrb[76].mxu1  ;;  %v1820_v21 = vpop.f32.mrb[92].mxu0  ;;  %2649 = vmatprep.subr.bf16.mxu1 %v2392_v32  ;;  %2690 = vmatprep.subr.bf16.mxu0 %v2394_v18 }
 0x26a   : > { %v1709_v22 = vpop.f32.mrb[77].mxu1  ;;  %v1822_v23 = vpop.f32.mrb[93].mxu0  ;;  %2650 = vmatpush1.bf16.msra.mxu1 %v2391_v16  ;;  %2691 = vmatpush1.bf16.msra.mxu0 %v2393_v17  ;;  %v2199_v26 = vmax.f32 %v1707_v19, 0.0  ;;  %v2201_v57 = vmax.f32 %v1820_v21, 0.0 }
 0x26b   : > { %v1711_v24 = vpop.f32.mrb[78].mxu1  ;;  %v1824_v25 = vpop.f32.mrb[94].mxu0  ;;  %v2200_v31 = vmax.f32 %v1709_v22, 0.0  ;;  %v2202_v34 = vmax.f32 %v1822_v23, 0.0 }
 0x26c   : > { %v2215_v27 = vmax.f32 %v1711_v24, 0.0  ;;  %v2217_v28 = vmax.f32 %v1824_v25, 0.0  ;;  %v1713_v29 = vpop.f32.mrb[79].mxu1  ;;  %v1826_v30 = vpop.f32.mrb[95].mxu0 }
 0x26d   : > { %v2216_v35 = vmax.f32 %v1713_v29, 0.0  ;;  %v2218_v36 = vmax.f32 %v1826_v30, 0.0 }
 0x26e   : > { %v2407_v37 = vpack.c.bf16 %v2215_v27, %v2199_v26  ;;  %v2409_v38 = vpack.c.bf16 %v2217_v28, %v2201_v57 }
 0x26f   : > { %v2408_v39 = vpack.c.bf16 %v2216_v35, %v2200_v31  ;;  %v2410_v40 = vpack.c.bf16 %v2218_v36, %v2202_v34 }
 0x271   : > { %v1717_v48 = vpop.f32.mrb[80].mxu1  ;;  %v1830_v41 = vpop.f32.mrb[96].mxu0  ;;  %2651 = vmatprep.subr.bf16.mxu1 %v2408_v39  ;;  %2692 = vmatprep.subr.bf16.mxu0 %v2410_v40 }
 0x272   : > { %v1719_v56 = vpop.f32.mrb[81].mxu1  ;;  %v1832_v42 = vpop.f32.mrb[97].mxu0  ;;  %2652 = vmatpush1.bf16.msra.mxu1 %v2407_v37  ;;  %2693 = vmatpush1.bf16.msra.mxu0 %v2409_v38  ;;  %v2231_v45 = vmax.f32 %v1717_v48, 0.0  ;;  %v2233_v46 = vmax.f32 %v1830_v41, 0.0 }
 0x273   : > { %v1721_v43 = vpop.f32.mrb[82].mxu1  ;;  %v1834_v44 = vpop.f32.mrb[98].mxu0  ;;  %v2232_v53 = vmax.f32 %v1719_v56, 0.0  ;;  %v2234_v54 = vmax.f32 %v1832_v42, 0.0 }
 0x274   : > { %v2247_v49 = vmax.f32 %v1721_v43, 0.0  ;;  %v2249_v50 = vmax.f32 %v1834_v44, 0.0  ;;  %v1723_v51 = vpop.f32.mrb[83].mxu1  ;;  %v1836_v52 = vpop.f32.mrb[99].mxu0 }
 0x275   : > { %v2248_v55 = vmax.f32 %v1723_v51, 0.0  ;;  %v2250_v58 = vmax.f32 %v1836_v52, 0.0 }
 0x276   : > { %v2423_v59 = vpack.c.bf16 %v2247_v49, %v2231_v45  ;;  %v2425_v60 = vpack.c.bf16 %v2249_v50, %v2233_v46 }
 0x277   : > { %v2424_v61 = vpack.c.bf16 %v2248_v55, %v2232_v53  ;;  %v2426_v62 = vpack.c.bf16 %v2250_v58, %v2234_v54 }
 0x279   : > { %v1727_v47 = vpop.f32.mrb[84].mxu1  ;;  %v1840_v63 = vpop.f32.mrb[100].mxu0  ;;  %2653 = vmatprep.subr.bf16.mxu1 %v2424_v61  ;;  %2694 = vmatprep.subr.bf16.mxu0 %v2426_v62 }
 0x27a   : > { %v1729_v0 = vpop.f32.mrb[85].mxu1  ;;  %v1842_v20 = vpop.f32.mrb[101].mxu0  ;;  %2654 = vmatpush1.bf16.msra.mxu1 %v2423_v59  ;;  %2695 = vmatpush1.bf16.msra.mxu0 %v2425_v60  ;;  %v2263_v4 = vmax.f32 %v1727_v47, 0.0  ;;  %v2265_v5 = vmax.f32 %v1840_v63, 0.0 }
 0x27b   : > { %v1731_v2 = vpop.f32.mrb[86].mxu1  ;;  %v1844_v3 = vpop.f32.mrb[102].mxu0  ;;  %v2264_v10 = vmax.f32 %v1729_v0, 0.0  ;;  %v2266_v33 = vmax.f32 %v1842_v20, 0.0 }
 0x27c   : > { %v2279_v6 = vmax.f32 %v1731_v2, 0.0  ;;  %v2281_v7 = vmax.f32 %v1844_v3, 0.0  ;;  %v1733_v8 = vpop.f32.mrb[87].mxu1  ;;  %v1846_v9 = vpop.f32.mrb[103].mxu0 }
 0x27d   : > { %v2280_v11 = vmax.f32 %v1733_v8, 0.0  ;;  %v2282_v12 = vmax.f32 %v1846_v9, 0.0 }
 0x27e   : > { %v2439_v13 = vpack.c.bf16 %v2279_v6, %v2263_v4  ;;  %v2441_v15 = vpack.c.bf16 %v2281_v7, %v2265_v5 }
 0x27f   : > { %v2440_v16 = vpack.c.bf16 %v2280_v11, %v2264_v10  ;;  %v2442_v17 = vpack.c.bf16 %v2282_v12, %v2266_v33 }
 0x281   : > { %v1737_v32 = vpop.f32.mrb[88].mxu1  ;;  %v1850_v18 = vpop.f32.mrb[104].mxu0  ;;  %2655 = vmatprep.subr.bf16.mxu1 %v2440_v16  ;;  %2696 = vmatprep.subr.bf16.mxu0 %v2442_v17 }
 0x282   : > { %v1739_v19 = vpop.f32.mrb[89].mxu1  ;;  %v1852_v21 = vpop.f32.mrb[105].mxu0  ;;  %2656 = vmatpush1.bf16.msra.mxu1 %v2439_v13  ;;  %2697 = vmatpush1.bf16.msra.mxu0 %v2441_v15  ;;  %v2295_v24 = vmax.f32 %v1737_v32, 0.0  ;;  %v2297_v25 = vmax.f32 %v1850_v18, 0.0 }
 0x283   : > { %v1741_v22 = vpop.f32.mrb[90].mxu1  ;;  %v1854_v23 = vpop.f32.mrb[106].mxu0  ;;  %v2296_v29 = vmax.f32 %v1739_v19, 0.0  ;;  %v2298_v30 = vmax.f32 %v1852_v21, 0.0 }
 0x284   : > { %v2311_v26 = vmax.f32 %v1741_v22, 0.0  ;;  %v2313_v57 = vmax.f32 %v1854_v23, 0.0  ;;  %v1743_v27 = vpop.f32.mrb[91].mxu1  ;;  %v1856_v28 = vpop.f32.mrb[107].mxu0 }
 0x285   : > { %v2312_v31 = vmax.f32 %v1743_v27, 0.0  ;;  %v2314_v34 = vmax.f32 %v1856_v28, 0.0 }
 0x286   : > { %v2455_v35 = vpack.c.bf16 %v2311_v26, %v2295_v24  ;;  %v2457_v36 = vpack.c.bf16 %v2313_v57, %v2297_v25 }
 0x287   : > { %v2456_v37 = vpack.c.bf16 %v2312_v31, %v2296_v29  ;;  %v2458_v38 = vpack.c.bf16 %v2314_v34, %v2298_v30 }
 0x289   : > { %v1747_v39 = vpop.f32.mrb[92].mxu1  ;;  %v1860_v40 = vpop.f32.mrb[108].mxu0  ;;  %2657 = vmatprep.subr.bf16.mxu1 %v2456_v37  ;;  %2698 = vmatprep.subr.bf16.mxu0 %v2458_v38 }
 0x28a   : > { %v1749_v48 = vpop.f32.mrb[93].mxu1  ;;  %v1862_v41 = vpop.f32.mrb[109].mxu0  ;;  %2658 = vmatpush1.bf16.msra.mxu1 %v2455_v35  ;;  %2699 = vmatpush1.bf16.msra.mxu0 %v2457_v36  ;;  %v2327_v43 = vmax.f32 %v1747_v39, 0.0  ;;  %v2329_v44 = vmax.f32 %v1860_v40, 0.0 }
 0x28b   : > { %v1751_v56 = vpop.f32.mrb[94].mxu1  ;;  %v1864_v42 = vpop.f32.mrb[110].mxu0  ;;  %v2328_v51 = vmax.f32 %v1749_v48, 0.0  ;;  %v2330_v52 = vmax.f32 %v1862_v41, 0.0 }
 0x28c   : > { %v2343_v45 = vmax.f32 %v1751_v56, 0.0  ;;  %v2345_v46 = vmax.f32 %v1864_v42, 0.0  ;;  %v1753_v49 = vpop.f32.mrb[95].mxu1  ;;  %v1866_v50 = vpop.f32.mrb[111].mxu0 }
 0x28d   : > { %v2344_v53 = vmax.f32 %v1753_v49, 0.0  ;;  %v2346_v54 = vmax.f32 %v1866_v50, 0.0 }
 0x28e   : > { %v2471_v55 = vpack.c.bf16 %v2343_v45, %v2327_v43  ;;  %v2473_v58 = vpack.c.bf16 %v2345_v46, %v2329_v44 }
 0x28f   : > { %v2472_v59 = vpack.c.bf16 %v2344_v53, %v2328_v51  ;;  %v2474_v60 = vpack.c.bf16 %v2346_v54, %v2330_v52 }
 0x291   : > { %v1903_v61 = vpop.f32.mrb[96].mxu1  ;;  %v2016_v62 = vpop.f32.mrb[112].mxu0  ;;  %2659 = vmatprep.subr.bf16.mxu1 %v2472_v59  ;;  %2700 = vmatprep.subr.bf16.mxu0 %v2474_v60 }
 0x292   : > { %v1905_v47 = vpop.f32.mrb[97].mxu1  ;;  %v2018_v63 = vpop.f32.mrb[113].mxu0  ;;  %2660 = vmatpush1.bf16.msra.mxu1 %v2471_v55  ;;  %2701 = vmatpush1.bf16.msra.mxu0 %v2473_v58  ;;  %v2107_v2 = vmax.f32 %v1903_v61, 0.0  ;;  %v2109_v3 = vmax.f32 %v2016_v62, 0.0 }
 0x293   : > { %v1907_v0 = vpop.f32.mrb[98].mxu1  ;;  %v2020_v20 = vpop.f32.mrb[114].mxu0  ;;  %v2108_v8 = vmax.f32 %v1905_v47, 0.0  ;;  %v2110_v9 = vmax.f32 %v2018_v63, 0.0 }
 0x294   : > { %v2123_v4 = vmax.f32 %v1907_v0, 0.0  ;;  %v2125_v5 = vmax.f32 %v2020_v20, 0.0  ;;  %v1909_v6 = vpop.f32.mrb[99].mxu1  ;;  %v2022_v7 = vpop.f32.mrb[115].mxu0 }
 0x295   : > { %v2124_v10 = vmax.f32 %v1909_v6, 0.0  ;;  %v2126_v33 = vmax.f32 %v2022_v7, 0.0  ;;  %2678 = vmatmul.mubr.bf16.vlgmr.msra.gmra.mrb[136].mxu1 %v3290_v1  ;;  %2719 = vmatmul.mubr.bf16.vlgmr.msra.gmra.mrb[152].mxu0 %v3290_v1 }
 0x296   : > { %v2363_v11 = vpack.c.bf16 %v2123_v4, %v2107_v2  ;;  %v2365_v12 = vpack.c.bf16 %v2125_v5, %v2109_v3  ;;  %2759 = vmatprep.mubr.bf16.mxu1 %v3289_v14  ;;  %2800 = vmatprep.mubr.bf16.mxu0 %v3289_v14 }
 0x297   : > { %v2364_v13 = vpack.c.bf16 %v2124_v10, %v2108_v8  ;;  %v2366_v15 = vpack.c.bf16 %v2126_v33, %v2110_v9 }
 0x299   : > { %v1913_v16 = vpop.f32.mrb[100].mxu1  ;;  %v2026_v17 = vpop.f32.mrb[116].mxu0  ;;  %2727 = vmatprep.subr.bf16.mxu1 %v2364_v13  ;;  %2768 = vmatprep.subr.bf16.mxu0 %v2366_v15 }
 0x29a   : > { %v1915_v32 = vpop.f32.mrb[101].mxu1  ;;  %v2028_v18 = vpop.f32.mrb[117].mxu0  ;;  %2728 = vmatpush1.bf16.msra.mxu1 %v2363_v11  ;;  %2769 = vmatpush1.bf16.msra.mxu0 %v2365_v12  ;;  %v2139_v22 = vmax.f32 %v1913_v16, 0.0  ;;  %v2141_v23 = vmax.f32 %v2026_v17, 0.0 }
 0x29b   : > { %v1917_v19 = vpop.f32.mrb[102].mxu1  ;;  %v2030_v21 = vpop.f32.mrb[118].mxu0  ;;  %v2140_v27 = vmax.f32 %v1915_v32, 0.0  ;;  %v2142_v14 = vmax.f32 %v2028_v18, 0.0 }
 0x29c   : > { %v2155_v24 = vmax.f32 %v1917_v19, 0.0  ;;  %v2157_v25 = vmax.f32 %v2030_v21, 0.0  ;;  %v1919_v26 = vpop.f32.mrb[103].mxu1  ;;  %v2032_v57 = vpop.f32.mrb[119].mxu0 }
 0x29d   : > { %v2156_v28 = vmax.f32 %v1919_v26, 0.0  ;;  %v2158_v29 = vmax.f32 %v2032_v57, 0.0 }
 0x29e   : > { %v2379_v30 = vpack.c.bf16 %v2155_v24, %v2139_v22  ;;  %v2381_v31 = vpack.c.bf16 %v2157_v25, %v2141_v23 }
 0x29f   : > { %v2380_v34 = vpack.c.bf16 %v2156_v28, %v2140_v27  ;;  %v2382_v35 = vpack.c.bf16 %v2158_v29, %v2142_v14 }
 0x2a1   : > { %v1923_v36 = vpop.f32.mrb[104].mxu1  ;;  %v2036_v37 = vpop.f32.mrb[120].mxu0  ;;  %2729 = vmatprep.subr.bf16.mxu1 %v2380_v34  ;;  %2770 = vmatprep.subr.bf16.mxu0 %v2382_v35 }
 0x2a2   : > { %v1925_v38 = vpop.f32.mrb[105].mxu1  ;;  %v2038_v39 = vpop.f32.mrb[121].mxu0  ;;  %2730 = vmatpush1.bf16.msra.mxu1 %v2379_v30  ;;  %2771 = vmatpush1.bf16.msra.mxu0 %v2381_v31  ;;  %v2171_v41 = vmax.f32 %v1923_v36, 0.0  ;;  %v2173_v56 = vmax.f32 %v2036_v37, 0.0 }
 0x2a3   : > { %v1927_v40 = vpop.f32.mrb[106].mxu1  ;;  %v2040_v48 = vpop.f32.mrb[122].mxu0  ;;  %v2172_v46 = vmax.f32 %v1925_v38, 0.0  ;;  %v2174_v49 = vmax.f32 %v2038_v39, 0.0 }
 0x2a4   : > { %v2187_v42 = vmax.f32 %v1927_v40, 0.0  ;;  %v2189_v43 = vmax.f32 %v2040_v48, 0.0  ;;  %v1929_v44 = vpop.f32.mrb[107].mxu1  ;;  %v2042_v45 = vpop.f32.mrb[123].mxu0 }
 0x2a5   : > { %v2188_v50 = vmax.f32 %v1929_v44, 0.0  ;;  %v2190_v51 = vmax.f32 %v2042_v45, 0.0 }
 0x2a6   : > { %v2395_v52 = vpack.c.bf16 %v2187_v42, %v2171_v41  ;;  %v2397_v53 = vpack.c.bf16 %v2189_v43, %v2173_v56 }
 0x2a7   : > { %v2396_v54 = vpack.c.bf16 %v2188_v50, %v2172_v46  ;;  %v2398_v55 = vpack.c.bf16 %v2190_v51, %v2174_v49 }
 0x2a9   : > { %v1933_v58 = vpop.f32.mrb[108].mxu1  ;;  %v2046_v59 = vpop.f32.mrb[124].mxu0  ;;  %2731 = vmatprep.subr.bf16.mxu1 %v2396_v54  ;;  %2772 = vmatprep.subr.bf16.mxu0 %v2398_v55 }
 0x2aa   : > { %v1935_v60 = vpop.f32.mrb[109].mxu1  ;;  %v2048_v61 = vpop.f32.mrb[125].mxu0  ;;  %2732 = vmatpush1.bf16.msra.mxu1 %v2395_v52  ;;  %2773 = vmatpush1.bf16.msra.mxu0 %v2397_v53  ;;  %v2203_v63 = vmax.f32 %v1933_v58, 0.0  ;;  %v2205_v0 = vmax.f32 %v2046_v59, 0.0 }
 0x2ab   : > { %v1937_v62 = vpop.f32.mrb[110].mxu1  ;;  %v2050_v47 = vpop.f32.mrb[126].mxu0  ;;  %v2204_v5 = vmax.f32 %v1935_v60, 0.0  ;;  %v2206_v6 = vmax.f32 %v2048_v61, 0.0 }
 0x2ac   : > { %v2219_v20 = vmax.f32 %v1937_v62, 0.0  ;;  %v2221_v2 = vmax.f32 %v2050_v47, 0.0  ;;  %v1939_v3 = vpop.f32.mrb[111].mxu1  ;;  %v2052_v4 = vpop.f32.mrb[127].mxu0 }
 0x2ad   : > { %v2220_v7 = vmax.f32 %v1939_v3, 0.0  ;;  %v2222_v8 = vmax.f32 %v2052_v4, 0.0 }
 0x2ae   : > { %v2411_v9 = vpack.c.bf16 %v2219_v20, %v2203_v63  ;;  %v2413_v10 = vpack.c.bf16 %v2221_v2, %v2205_v0 }
 0x2af   : > { %v2412_v33 = vpack.c.bf16 %v2220_v7, %v2204_v5  ;;  %v2414_v11 = vpack.c.bf16 %v2222_v8, %v2206_v6 }
 0x2b1   : > { %v1943_v12 = vpop.f32.mrb[112].mxu1  ;;  %v2056_v13 = vpop.f32.mrb[128].mxu0  ;;  %2733 = vmatprep.subr.bf16.mxu1 %v2412_v33  ;;  %2774 = vmatprep.subr.bf16.mxu0 %v2414_v11 }
 0x2b2   : > { %v1945_v15 = vpop.f32.mrb[113].mxu1  ;;  %v2058_v16 = vpop.f32.mrb[129].mxu0  ;;  %2734 = vmatpush1.bf16.msra.mxu1 %v2411_v9  ;;  %2775 = vmatpush1.bf16.msra.mxu0 %v2413_v10  ;;  %v2235_v18 = vmax.f32 %v1943_v12, 0.0  ;;  %v2237_v19 = vmax.f32 %v2056_v13, 0.0 }
 0x2b3   : > { %v1947_v17 = vpop.f32.mrb[114].mxu1  ;;  %v2060_v32 = vpop.f32.mrb[130].mxu0  ;;  %v2236_v25 = vmax.f32 %v1945_v15, 0.0  ;;  %v2238_v26 = vmax.f32 %v2058_v16, 0.0 }
 0x2b4   : > { %v2251_v21 = vmax.f32 %v1947_v17, 0.0  ;;  %v2253_v22 = vmax.f32 %v2060_v32, 0.0  ;;  %v1949_v23 = vpop.f32.mrb[115].mxu1  ;;  %v2062_v24 = vpop.f32.mrb[131].mxu0 }
 0x2b5   : > { %v2252_v57 = vmax.f32 %v1949_v23, 0.0  ;;  %v2254_v27 = vmax.f32 %v2062_v24, 0.0 }
 0x2b6   : > { %v2427_v14 = vpack.c.bf16 %v2251_v21, %v2235_v18  ;;  %v2429_v28 = vpack.c.bf16 %v2253_v22, %v2237_v19 }
 0x2b7   : > { %v2428_v29 = vpack.c.bf16 %v2252_v57, %v2236_v25  ;;  %v2430_v30 = vpack.c.bf16 %v2254_v27, %v2238_v26 }
 0x2b9   : > { %v1953_v31 = vpop.f32.mrb[116].mxu1  ;;  %v2066_v34 = vpop.f32.mrb[132].mxu0  ;;  %2735 = vmatprep.subr.bf16.mxu1 %v2428_v29  ;;  %2776 = vmatprep.subr.bf16.mxu0 %v2430_v30  ;;  %v2832_v30 = vlaneseq }
 0x2ba   : > { %v1955_v35 = vpop.f32.mrb[117].mxu1  ;;  %v2068_v36 = vpop.f32.mrb[133].mxu0  ;;  %2736 = vmatpush1.bf16.msra.mxu1 %v2427_v14  ;;  %2777 = vmatpush1.bf16.msra.mxu0 %v2429_v28  ;;  %v2267_v39 = vmax.f32 %v1953_v31, 0.0  ;;  %v2269_v40 = vmax.f32 %v2066_v34, 0.0  ;;  %v3291_v28 = vmov 1966171168  }
 0x2bb   : > { %v1957_v37 = vpop.f32.mrb[118].mxu1  ;;  %v2070_v38 = vpop.f32.mrb[134].mxu0  ;;  %v2268_v43 = vmax.f32 %v1955_v35, 0.0  ;;  %v2270_v44 = vmax.f32 %v2068_v36, 0.0  ;;  %v2830_v29 = vunpack.c.l.s4 %v3291_v28  ;;  %v2833_v34 = vshrl.u32 %v2832_v30, 7 }
 0x2bc   : > { %v2283_v48 = vmax.f32 %v1957_v37, 0.0  ;;  %v2285_v41 = vmax.f32 %v2070_v38, 0.0  ;;  %v1959_v56 = vpop.f32.mrb[119].mxu1  ;;  %v2072_v42 = vpop.f32.mrb[135].mxu0 }
 0x2bd   : > { %v2284_v45 = vmax.f32 %v1959_v56, 0.0  ;;  %v2286_v46 = vmax.f32 %v2072_v42, 0.0  ;;  %v2831_v31 = vunpack.c.0.s8 %v2830_v29  ;;  %v2480_v29 = vld [vmem:[#allocation2 + $0x8] sm:$0xff] }
 0x2be   : > { %v2443_v49 = vpack.c.bf16 %v2283_v48, %v2267_v39  ;;  %v2445_v50 = vpack.c.bf16 %v2285_v41, %v2269_v40 }
 0x2bf   : > { %v2444_v51 = vpack.c.bf16 %v2284_v45, %v2268_v43  ;;  %v2446_v52 = vpack.c.bf16 %v2286_v46, %v2270_v44  ;;  %v2834_v37 = vsub.s32 %v2831_v31, %v2833_v34 }
 0x2c1   : > { %v1963_v53 = vpop.f32.mrb[120].mxu1  ;;  %v2076_v54 = vpop.f32.mrb[136].mxu0  ;;  %2737 = vmatprep.subr.bf16.mxu1 %v2444_v51  ;;  %2778 = vmatprep.subr.bf16.mxu0 %v2446_v52 }
 0x2c2   : > { %v1965_v55 = vpop.f32.mrb[121].mxu1  ;;  %v2078_v58 = vpop.f32.mrb[137].mxu0  ;;  %2738 = vmatpush1.bf16.msra.mxu1 %v2443_v49  ;;  %2779 = vmatpush1.bf16.msra.mxu0 %v2445_v50  ;;  %v2299_v61 = vmax.f32 %v1963_v53, 0.0  ;;  %v2301_v62 = vmax.f32 %v2076_v54, 0.0 }
 0x2c3   : > { %v1967_v59 = vpop.f32.mrb[122].mxu1  ;;  %v2080_v60 = vpop.f32.mrb[138].mxu0  ;;  %v2300_v2 = vmax.f32 %v1965_v55, 0.0  ;;  %v2302_v3 = vmax.f32 %v2078_v58, 0.0 }
 0x2c4   : > { %v2315_v47 = vmax.f32 %v1967_v59, 0.0  ;;  %v2317_v63 = vmax.f32 %v2080_v60, 0.0  ;;  %v1969_v0 = vpop.f32.mrb[123].mxu1  ;;  %v2082_v20 = vpop.f32.mrb[139].mxu0 }
 0x2c5   : > { %v2316_v4 = vmax.f32 %v1969_v0, 0.0  ;;  %v2318_v5 = vmax.f32 %v2082_v20, 0.0  ;;  %v2479_v0 = vld [vmem:[#allocation2] sm:$0xff] }
 0x2c6   : > { %v2459_v6 = vpack.c.bf16 %v2315_v47, %v2299_v61  ;;  %v2461_v7 = vpack.c.bf16 %v2317_v63, %v2301_v62 }
 0x2c7   : > { %v2460_v8 = vpack.c.bf16 %v2316_v4, %v2300_v2  ;;  %v2462_v9 = vpack.c.bf16 %v2318_v5, %v2302_v3 }
 0x2c9   : > { %v1973_v10 = vpop.f32.mrb[124].mxu1  ;;  %v2086_v33 = vpop.f32.mrb[140].mxu0  ;;  %2739 = vmatprep.subr.bf16.mxu1 %v2460_v8  ;;  %2780 = vmatprep.subr.bf16.mxu0 %v2462_v9 }
 0x2ca   : > { %v1975_v11 = vpop.f32.mrb[125].mxu1  ;;  %v2088_v12 = vpop.f32.mrb[141].mxu0  ;;  %2740 = vmatpush1.bf16.msra.mxu1 %v2459_v6  ;;  %2781 = vmatpush1.bf16.msra.mxu0 %v2461_v7  ;;  %v2331_v16 = vmax.f32 %v1973_v10, 0.0  ;;  %v2333_v17 = vmax.f32 %v2086_v33, 0.0 }
 0x2cb   : > { %v1977_v13 = vpop.f32.mrb[126].mxu1  ;;  %v2090_v15 = vpop.f32.mrb[142].mxu0  ;;  %v2332_v22 = vmax.f32 %v1975_v11, 0.0  ;;  %v2334_v23 = vmax.f32 %v2088_v12, 0.0 }
 0x2cc   : > { %v2347_v32 = vmax.f32 %v1977_v13, 0.0  ;;  %v2349_v18 = vmax.f32 %v2090_v15, 0.0  ;;  %v1979_v19 = vpop.f32.mrb[127].mxu1  ;;  %v2092_v21 = vpop.f32.mrb[143].mxu0 }
 0x2cd   : > { %v2348_v24 = vmax.f32 %v1979_v19, 0.0  ;;  %v2350_v25 = vmax.f32 %v2092_v21, 0.0 }
 0x2ce   : > { %v2475_v26 = vpack.c.bf16 %v2347_v32, %v2331_v16  ;;  %v2477_v57 = vpack.c.bf16 %v2349_v18, %v2333_v17 }
 0x2cf   : > { %v2476_v27 = vpack.c.bf16 %v2348_v24, %v2332_v22  ;;  %v2478_v14 = vpack.c.bf16 %v2350_v25, %v2334_v23 }
 0x2d1   : > { %2741 = vmatprep.subr.bf16.mxu1 %v2476_v27  ;;  %2782 = vmatprep.subr.bf16.mxu0 %v2478_v14 }
 0x2d2   : > { %2742 = vmatpush1.bf16.msra.mxu1 %v2475_v26  ;;  %2783 = vmatpush1.bf16.msra.mxu0 %v2477_v57 }
 0x2d5   : > { %2760 = vmatmul.mubr.bf16.vlgmr.msra.gmra.mrb[140].mxu1 %v3290_v1  ;;  %2801 = vmatmul.mubr.bf16.vlgmr.msra.gmra.mrb[156].mxu0 %v3290_v1 }
 0x2e8   : > { %v2515_v35 = vpop.f32.mrb[128].mxu1  ;;  %v2556_v36 = vpop.f32.mrb[144].mxu0 }
 0x2e9   : > { %v2517_v38 = vpop.f32.mrb[129].mxu1  ;;  %v2558_v39 = vpop.f32.mrb[145].mxu0 }
 0x2ea   : > { %v2825_v40 = vcombine.low %v2515_v35, %v2517_v38  ;;  %v2826_v48 = vcombine.low %v2556_v36, %v2558_v39  ;;  %v2519_v41 = vpop.f32.mrb[130].mxu1  ;;  %v2560_v56 = vpop.f32.mrb[146].mxu0 }
 0x2eb   : > { %v2520_v42 = vpop.f32.mrb[131].mxu1  ;;  %v2561_v43 = vpop.f32.mrb[147].mxu0 }
 0x2ec   : > { %v2835_v44 = vrot.slane %v2825_v40, %v2834_v37  ;;  %v2842_v45 = vrot.slane %v2826_v48, %v2834_v37 }
 0x2ee   : > { %v2857_v46 = vcombine.low %v2835_v44, %v2842_v45 }
 0x2f0   : > { %v2865_v62 = vrot.slane %v2857_v46, %v2834_v37 }
 0x328   : > { %v2597_v1 = vpop.f32.mrb[132].mxu1  ;;  %v2638_v49 = vpop.f32.mrb[148].mxu0 }
 0x329   : > { %v2599_v50 = vpop.f32.mrb[133].mxu1  ;;  %v2640_v51 = vpop.f32.mrb[149].mxu0 }
 0x32a   : > { %v2827_v52 = vcombine.low %v2597_v1, %v2599_v50  ;;  %v2828_v53 = vcombine.low %v2638_v49, %v2640_v51  ;;  %v2601_v54 = vpop.f32.mrb[134].mxu1  ;;  %v2642_v55 = vpop.f32.mrb[150].mxu0 }
 0x32b   : > { %v2602_v58 = vpop.f32.mrb[135].mxu1  ;;  %v2643_v59 = vpop.f32.mrb[151].mxu0 }
 0x32c   : > { %v2849_v60 = vrot.slane %v2827_v52, %v2834_v37  ;;  %v2856_v61 = vrot.slane %v2828_v53, %v2834_v37 }
 0x32e   : > { %v2858_v47 = vcombine.low %v2849_v60, %v2856_v61 }
 0x330   : > { %v2872_v63 = vrot.slane %v2858_v47, %v2834_v37 }
 0x332   : > { %v2873_v20 = vcombine.low %v2865_v62, %v2872_v63 }
 0x334   : > { %v2925_v2 = vadd.f32 %v2873_v20, %v2479_v0 }
 0x336   : > { %2927 = vst [vmem:[#allocation2] sm:$0xff] %v2925_v2 }
 0x33d   : > { %v2933_v34 = vld [vmem:[#allocation2] sm:$0xff] (!%p3161_p8) }
 0x33e   : > { %v2935_v36 = vmul.f32 (!%p3161_p8), 0.0044444446, %v2933_v34 }
 0x340   : > { %2937 = vst [vmem:[%s3348_s26] sm:$0xff] (!%p3161_p8), %v2935_v36 }
 0x368   : > { %v2679_v3 = vpop.f32.mrb[136].mxu1  ;;  %v2720_v4 = vpop.f32.mrb[152].mxu0 }
 0x369   : > { %v2681_v5 = vpop.f32.mrb[137].mxu1  ;;  %v2722_v6 = vpop.f32.mrb[153].mxu0 }
 0x36a   : > { %v2874_v7 = vcombine.low %v2679_v3, %v2681_v5  ;;  %v2875_v8 = vcombine.low %v2720_v4, %v2722_v6  ;;  %v2683_v9 = vpop.f32.mrb[138].mxu1  ;;  %v2724_v10 = vpop.f32.mrb[154].mxu0 }
 0x36b   : > { %v2684_v33 = vpop.f32.mrb[139].mxu1  ;;  %v2725_v11 = vpop.f32.mrb[155].mxu0 }
 0x36c   : > { %v2884_v12 = vrot.slane %v2874_v7, %v2834_v37  ;;  %v2891_v13 = vrot.slane %v2875_v8, %v2834_v37 }
 0x36e   : > { %v2906_v15 = vcombine.low %v2884_v12, %v2891_v13 }
 0x370   : > { %v2914_v14 = vrot.slane %v2906_v15, %v2834_v37 }
 0x3a8   : > { %v2761_v16 = vpop.f32.mrb[140].mxu1  ;;  %v2802_v17 = vpop.f32.mrb[156].mxu0 }
 0x3a9   : > { %v2763_v32 = vpop.f32.mrb[141].mxu1  ;;  %v2804_v18 = vpop.f32.mrb[157].mxu0 }
 0x3aa   : > { %v2876_v19 = vcombine.low %v2761_v16, %v2763_v32  ;;  %v2877_v21 = vcombine.low %v2802_v17, %v2804_v18  ;;  %v2765_v22 = vpop.f32.mrb[142].mxu1  ;;  %v2806_v23 = vpop.f32.mrb[158].mxu0 }
 0x3ab   : > { %v2766_v24 = vpop.f32.mrb[143].mxu1  ;;  %v2807_v25 = vpop.f32.mrb[159].mxu0 }
 0x3ac   : > { %v2898_v26 = vrot.slane %v2876_v19, %v2834_v37  ;;  %v2905_v57 = vrot.slane %v2877_v21, %v2834_v37 }
 0x3ae   : > { %v2907_v27 = vcombine.low %v2898_v26, %v2905_v57 }
 0x3b0   : > { %v2921_v28 = vrot.slane %v2907_v27, %v2834_v37  ;;  %2932 = sbr.rel (%p3161_p8) target bundleno = 961 (0x3c1), region = 40 }
 0x3b2   : > { %v2922_v30 = vcombine.low %v2914_v14, %v2921_v28 }
 0x3b4   : > { %v2926_v31 = vadd.f32 %v2922_v30, %v2480_v29 }
 0x3b6   : > { %2928 = vst [vmem:[#allocation2 + $0x8] sm:$0xff] %v2926_v31 }
 0x3bd   : > { %v2934_v35 = vld [vmem:[#allocation2 + $0x8] sm:$0xff] }
 0x3be   : > { %v2936_v38 = vmul.f32 0.0044444446, %v2934_v35 }
 0x3c0   : > { %2938 = vst [vmem:[%s3348_s26 + $0x8] sm:$0xff] %v2936_v38 }
 0x3c1 PF: > { %s13_s16 = sadd.s32 1, %s3286_s16   ;;  %s3944_s12 = smov %s3278_s14 }
 0x3c2   : > { %p10_p9 = scmp.ge.s32.totalorder %s13_s16, 6   ;;  %s3945_s13 = smov %s3282_s15 }
 0x3c3   : > { %s3946_s14 = smov %s3949_s17  ;;  %s3947_s15 = smov %s3953_s18 }
 0x3c4   :  { %12 = sbr.rel (!%p10_p9) target bundleno = 3 (0x3), region = 70 }

</bundles_post_ra>
